<compile_context>
chip_gen: v6e
topology: v6e:2x2x1
jax: 0.10.0
libtpu: 0.0.40
codegen_flags: <defaults>
</compile_context>

<pallas_src>
import functools

import numpy as np
import jax
import jax.numpy as jnp
from jax import lax
from jax.experimental import pallas as pl
from jax.experimental.pallas import tpu as pltpu

# ---- problem sizes (small, consistent with the module) ----
B = 8            # batch
INP_DIM = 16     # input feature dim
N_D = 8
N_A = 8
OD = N_D + N_A   # 16, FeatureTransformer output dim
GLU_W = 2 * OD   # 32, GLU pre-activation width
EPS_BN = 1e-5
SCALE = float(np.sqrt(0.5))
VBS = 1024       # GBN virtual batch size

# ---- activation slab layout: (B, 48) f32, 16-aligned lane offsets ----
A_OFF, X_OFF, PR_OFF = 0, 16, 32
ACT_W = 48

# ---- single parameter slab layout: (88, 32) f32, all offsets 8-aligned ----
ATT_R = 0                       # rows  0:8   att_w (N_A, INP_DIM), lanes 0:16 used
G0_R = ATT_R + N_A              # rows  8:24  w0 (INP_DIM, 2*OD)
G1_R = G0_R + INP_DIM           # rows 24:40  w1 (OD, 2*OD)
G2_R = G1_R + OD                # rows 40:56  w2 (OD, 2*OD)
G3_R = G2_R + OD                # rows 56:72  w3 (OD, 2*OD)
BN_R = G3_R + OD                # rows 72:82  BN gamma/beta rows (see pack_params)
P_ROWS = 88                     # padded to a multiple of 8

LOSS_LANES = 128                # lane-dense per-chunk partial-sum block


# ---------------- in-kernel math helpers (traced inside the kernel) ----------------
def _bn_train(t, gamma, beta, inv_n):
    # Training-mode BatchNorm1d with batch stats, single reduction pass:
    # one sublane reduce over [t | t*t], var = E[t^2] - mean^2, affine folded
    # into a single scale/shift.
    w = t.shape[-1]
    s = jnp.sum(jnp.concatenate([t, t * t], axis=-1), axis=0, keepdims=True) * inv_n
    mean = s[:, :w]
    var = jnp.maximum(s[:, w:] - mean * mean, 0.0)
    scale = gamma * lax.rsqrt(var + EPS_BN)
    return t * scale + (beta - mean * scale)


def _sparsemax_lastdim(z):
    # Sort-free sparsemax along the last dim (O(D^2) pairwise ranks; D = 16).
    d = z.shape[-1]
    z = z - jnp.max(z, axis=-1, keepdims=True)
    zi = z[:, :, None]                                     # (B, D, 1)
    zj = z[:, None, :]                                     # (B, 1, D)
    ii = lax.broadcasted_iota(jnp.int32, (1, d, d), 1)
    jj = lax.broadcasted_iota(jnp.int32, (1, d, d), 2)
    # ge[b,i,j] == 1 iff element j ranks at-or-before element i in a stable
    # descending sort of row b (ties broken by original index).
    ge = ((zj > zi) | ((zj == zi) & (jj <= ii))).astype(jnp.float32)
    # Fused reduction: rank and csum from ONE pass over [ge ; ge*zj].
    red = jnp.sum(jnp.concatenate([ge, ge * zj], axis=1), axis=-1)   # (B, 2D)
    rank = red[:, :d]                                      # rank in 1..D
    csum = red[:, d:] - 1.0                                # cumsum of sorted vals - 1
    support = rank * z > csum
    # Inside the support csum/rank is strictly increasing with rank, so its
    # max equals cumsum_K / K == tau (rank >= 1 everywhere -> no div-by-zero).
    tau = jnp.max(jnp.where(support, csum / rank, -jnp.inf),
                  axis=-1, keepdims=True)                  # (B, 1)
    return jnp.maximum(z - tau, 0.0)


def _glu(inp, w, gamma, beta, inv_n):
    # Linear bias intentionally omitted: the training-mode BatchNorm that
    # follows subtracts the per-column batch mean, cancelling it exactly.
    t = jnp.dot(inp, w, preferred_element_type=jnp.float32)
    t = _bn_train(t, gamma, beta, inv_n)
    return t[:, :OD] * jax.nn.sigmoid(t[:, OD:])


# ---------------- the Pallas kernel: one GBN virtual batch per grid point ----------------
def decision_step_kernel(act_ref, p_ref, out_ref, loss_ref, *, inv_chunk):
    act = act_ref[...]                                       # (chunk, 48)
    a = act[:, A_OFF:A_OFF + N_A]                            # (chunk, 8)
    x = act[:, X_OFF:X_OFF + INP_DIM]                        # (chunk, 16)
    priors = act[:, PR_OFF:PR_OFF + INP_DIM]                 # (chunk, 16)

    bn = p_ref[BN_R:BN_R + 16, :]                            # (16, 32); rows 10:16 are padding

    # ---- AttentionTransformer ----
    att_w = p_ref[ATT_R:ATT_R + N_A, :]                      # (8, 32), lanes 16:32 are zero pad
    h = jnp.dot(a, att_w, preferred_element_type=jnp.float32)[:, :INP_DIM]
    h = _bn_train(h, bn[0:1, :INP_DIM], bn[1:2, :INP_DIM], inv_chunk)
    mask = _sparsemax_lastdim(h * priors)                    # (chunk, 16)

    # ---- per-chunk sparse-loss partial sum (lane-dense block; mean taken in wrapper) ----
    neg = -mask * jnp.log(mask + 1e-10)
    loss_ref[...] = jnp.zeros((1, LOSS_LANES), jnp.float32) + jnp.sum(neg)

    # ---- FeatureTransformer (2 shared + 2 independent GLU blocks) ----
    y = x * mask
    y = _glu(y, p_ref[G0_R:G0_R + INP_DIM, :], bn[2:3, :], bn[3:4, :], inv_chunk)
    y = (y + _glu(y, p_ref[G1_R:G1_R + OD, :], bn[4:5, :], bn[5:6, :], inv_chunk)) * SCALE
    y = (y + _glu(y, p_ref[G2_R:G2_R + OD, :], bn[6:7, :], bn[7:8, :], inv_chunk)) * SCALE
    y = (y + _glu(y, p_ref[G3_R:G3_R + OD, :], bn[8:9, :], bn[9:10, :], inv_chunk)) * SCALE
    out_ref[...] = y


def pack_activations(x, a, priors):
    pad_a = jnp.pad(a, ((0, 0), (0, 16 - N_A)))              # lanes 8:16 zero
    return jnp.concatenate([pad_a, x, priors], axis=1)        # (B, 48)


def decision_step(x, a, priors, param_slab, *, vbs=VBS):
    bt = x.shape[0]
    chunk = bt if bt <= vbs else vbs
    assert bt % chunk == 0, "TODO(synk): ragged GBN chunking not supported"
    num_chunks = bt // chunk
    act = pack_activations(x, a, priors)

    kernel = functools.partial(decision_step_kernel, inv_chunk=1.0 / float(chunk))
    out, loss_parts = pl.pallas_call(
        kernel,
        grid=(num_chunks,),
        in_specs=[
            pl.BlockSpec((chunk, ACT_W), lambda i: (i, 0)),       # per-virtual-batch activations
            pl.BlockSpec((P_ROWS, GLU_W), lambda i: (0, 0)),      # resident parameter slab
        ],
        out_specs=(
            pl.BlockSpec((chunk, OD), lambda i: (i, 0)),
            pl.BlockSpec((1, LOSS_LANES), lambda i: (i, 0)),
        ),
        out_shape=(
            jax.ShapeDtypeStruct((bt, OD), jnp.float32),
            jax.ShapeDtypeStruct((num_chunks, LOSS_LANES), jnp.float32),
        ),
        compiler_params=pltpu.CompilerParams(
            dimension_semantics=("parallel",),                    # uses v7x's 2nd TC; no-op on v5e/v6e
            vmem_limit_bytes=16 * 1024 * 1024,                    # explicit, fits v7x's smaller VMEM
        ),
    )(act, param_slab)

    loss = jnp.sum(loss_parts[:, 0]) * (1.0 / float(bt * INP_DIM))
    return out, loss


# ---------------- pure-JAX reference (faithful to the PyTorch module, incl. biases) ----------------
def _batchnorm_ref(h, gamma, beta):
    mean = jnp.mean(h, axis=0, keepdims=True)
    var = jnp.mean((h - mean) ** 2, axis=0, keepdims=True)
    return (h - mean) * (gamma * lax.rsqrt(var + EPS_BN)) + beta


def _sparsemax_ref(z):
    d = z.shape[-1]
    z = z - jnp.max(z, axis=-1, keepdims=True)
    z_srt = -jnp.sort(-z, axis=-1)                           # descending
    cumsum = jnp.cumsum(z_srt, axis=-1) - 1.0
    rhos = jnp.arange(1, d + 1, dtype=z.dtype)
    support = rhos * z_srt > cumsum
    k = jnp.sum(support, axis=-1, keepdims=True)
    tau = jnp.take_along_axis(cumsum, k.astype(jnp.int32) - 1, axis=-1) / k.astype(z.dtype)
    return jnp.maximum(z - tau, 0.0)


def _glu_ref(inp, w, b, gamma, beta):
    t = inp @ w + b
    t = _batchnorm_ref(t, gamma, beta)
    return t[:, :OD] * jax.nn.sigmoid(t[:, OD:])


def decision_step_ref(x, a, priors, p):
    h = a @ p["att_w"] + p["att_b"]
    h = _batchnorm_ref(h, p["att_g"], p["att_be"])
    mask = _sparsemax_ref(h * priors)
    loss = jnp.mean(-mask * jnp.log(mask + 1e-10))
    y = x * mask
    y = _glu_ref(y, p["w0"], p["b0"], p["g0"], p["be0"])
    y = (y + _glu_ref(y, p["w1"], p["b1"], p["g1"], p["be1"])) * SCALE
    y = (y + _glu_ref(y, p["w2"], p["b2"], p["g2"], p["be2"])) * SCALE
    y = (y + _glu_ref(y, p["w3"], p["b3"], p["g3"], p["be3"])) * SCALE
    return y, loss


# ---------------- deterministic parameter construction & packing ----------------
def make_params(key):
    ks = jax.random.split(key, 20)
    f32 = jnp.float32

    def lin(kw, kb, fan_in, fan_out):
        bound = 1.0 / np.sqrt(fan_in)
        w = jax.random.uniform(kw, (fan_in, fan_out), f32, -bound, bound)
        b = jax.random.uniform(kb, (1, fan_out), f32, -bound, bound)
        return w, b

    def bn(kg, kb, dim):
        g = 1.0 + 0.1 * jax.random.normal(kg, (1, dim), f32)
        be = 0.1 * jax.random.normal(kb, (1, dim), f32)
        return g, be

    p = {}
    p["att_w"], p["att_b"] = lin(ks[0], ks[1], N_A, INP_DIM)
    p["att_g"], p["att_be"] = bn(ks[2], ks[3], INP_DIM)
    # GLU 0 (shared[0]): inp_dim -> 2*OD ; GLUs 1..3: OD -> 2*OD
    p["w0"], p["b0"] = lin(ks[4], ks[5], INP_DIM, GLU_W)
    p["g0"], p["be0"] = bn(ks[6], ks[7], GLU_W)
    p["w1"], p["b1"] = lin(ks[8], ks[9], OD, GLU_W)
    p["g1"], p["be1"] = bn(ks[10], ks[11], GLU_W)
    p["w2"], p["b2"] = lin(ks[12], ks[13], OD, GLU_W)
    p["g2"], p["be2"] = bn(ks[14], ks[15], GLU_W)
    p["w3"], p["b3"] = lin(ks[16], ks[17], OD, GLU_W)
    p["g3"], p["be3"] = bn(ks[18], ks[19], GLU_W)
    return p


def pack_params(p):
    # One-time packing ("init" time, not per call). Linear biases are NOT
    # packed: training-mode BatchNorm cancels them exactly.
    def pad32(r):  # (rows, 16) -> (rows, 32) with zero padding on lanes 16:32
        return jnp.pad(r, ((0, 0), (0, GLU_W - INP_DIM)))

    slab = jnp.concatenate(
        [pad32(p["att_w"]),                                   # rows  0:8
         p["w0"], p["w1"], p["w2"], p["w3"],                  # rows  8:72
         pad32(p["att_g"]), pad32(p["att_be"]),               # rows 72:74
         p["g0"], p["be0"], p["g1"], p["be1"],                # rows 74:78
         p["g2"], p["be2"], p["g3"], p["be3"]], axis=0)       # rows 78:82
    slab = jnp.pad(slab, ((0, P_ROWS - slab.shape[0]), (0, 0)))
    assert slab.shape == (P_ROWS, GLU_W)
    return slab


if __name__ == "__main__":
    key = jax.random.PRNGKey(0)
    kx, ka, kp = jax.random.split(key, 3)
    x = jax.random.normal(kx, (B, INP_DIM), jnp.float32)
    a = jax.random.normal(ka, (B, N_A), jnp.float32)
    priors = jnp.ones((B, INP_DIM), jnp.float32)   # initial TabNet priors
    params = make_params(kp)
    param_slab = pack_params(params)

    out, loss = decision_step(x, a, priors, param_slab)
    out, loss = jax.block_until_ready((out, loss))

    out_ref, loss_ref = decision_step_ref(x, a, priors, params)
    np.testing.assert_allclose(np.asarray(out), np.asarray(out_ref), rtol=2e-3, atol=2e-3)
    np.testing.assert_allclose(np.asarray(loss), np.asarray(loss_ref), rtol=2e-3, atol=2e-3)

    print("KERNEL_OK")
</pallas_src>

<mosaic_0001>
module attributes {stable_mosaic.version = 11 : i64} {
  func.func @decision_step_kernel(%arg0: i32, %arg1: memref<8x48xf32, #tpu.memory_space<vmem>>, %arg2: memref<88x32xf32, #tpu.memory_space<vmem>>, %arg3: memref<8x16xf32, #tpu.memory_space<vmem>>, %arg4: memref<1x128xf32, #tpu.memory_space<vmem>>) attributes {dimension_semantics = [#tpu.dimension_semantics<parallel>], iteration_bounds = array<i64: 1>, scalar_prefetch = 0 : i64, scratch_operands = 0 : i64, tpu.core_type = #tpu.core_type<tc>, window_params = [{transform_indices = @transform_0, window_bounds = array<i64: 8, 48>}, {pipeline_mode = #tpu.pipeline_mode<synchronous>, transform_indices = @transform_1, window_bounds = array<i64: 88, 32>}, {transform_indices = @transform_2, window_bounds = array<i64: 8, 16>}, {transform_indices = @transform_3, window_bounds = array<i64: 1, 128>}]} {
    %c0 = arith.constant 0 : index
    %c0_0 = arith.constant 0 : index
    %0 = vector.load %arg1[%c0, %c0_0] : memref<8x48xf32, #tpu.memory_space<vmem>>, vector<8x48xf32>
    %1 = vector.extract_strided_slice %0 {offsets = [0, 0], sizes = [8, 8], strides = [1, 1]} : vector<8x48xf32> to vector<8x8xf32>
    %2 = vector.extract_strided_slice %0 {offsets = [0, 16], sizes = [8, 16], strides = [1, 1]} : vector<8x48xf32> to vector<8x16xf32>
    %3 = vector.extract_strided_slice %0 {offsets = [0, 32], sizes = [8, 16], strides = [1, 1]} : vector<8x48xf32> to vector<8x16xf32>
    %c72 = arith.constant 72 : index
    %c0_1 = arith.constant 0 : index
    %4 = vector.load %arg2[%c72, %c0_1] : memref<88x32xf32, #tpu.memory_space<vmem>>, vector<16x32xf32>
    %c0_2 = arith.constant 0 : index
    %c0_3 = arith.constant 0 : index
    %5 = vector.load %arg2[%c0_2, %c0_3] : memref<88x32xf32, #tpu.memory_space<vmem>>, vector<8x32xf32>
    %cst = arith.constant dense<0.000000e+00> : vector<8x32xf32>
    %6 = tpu.matmul %1, %5, %cst {dimension_numbers = #tpu.dot_dimension_numbers<[1], [0], [0], [1], [0, 0, 1, 1], [], []>} : vector<8x8xf32>, vector<8x32xf32>, vector<8x32xf32> -> vector<8x32xf32>
    %7 = vector.extract_strided_slice %6 {offsets = [0, 0], sizes = [8, 16], strides = [1, 1]} : vector<8x32xf32> to vector<8x16xf32>
    %8 = vector.extract_strided_slice %4 {offsets = [0, 0], sizes = [1, 16], strides = [1, 1]} : vector<16x32xf32> to vector<1x16xf32>
    %9 = vector.extract_strided_slice %4 {offsets = [1, 0], sizes = [1, 16], strides = [1, 1]} : vector<16x32xf32> to vector<1x16xf32>
    %10 = arith.mulf %7, %7 : vector<8x16xf32>
    %11 = tpu.concatenate %7, %10 in 1 : vector<8x16xf32>, vector<8x16xf32> -> vector<8x32xf32>
    %cst_4 = arith.constant dense<0.000000e+00> : vector<32xf32>
    %12 = vector.multi_reduction <add>, %11, %cst_4 [0] : vector<8x32xf32> to vector<32xf32>
    %13 = vector.shape_cast %12 : vector<32xf32> to vector<1x32xf32>
    %cst_5 = arith.constant 1.250000e-01 : f32
    %14 = vector.broadcast %cst_5 : f32 to vector<1x32xf32>
    %15 = arith.mulf %13, %14 : vector<1x32xf32>
    %16 = vector.extract_strided_slice %15 {offsets = [0, 0], sizes = [1, 16], strides = [1, 1]} : vector<1x32xf32> to vector<1x16xf32>
    %17 = vector.extract_strided_slice %15 {offsets = [0, 16], sizes = [1, 16], strides = [1, 1]} : vector<1x32xf32> to vector<1x16xf32>
    %18 = arith.mulf %16, %16 : vector<1x16xf32>
    %19 = arith.subf %17, %18 : vector<1x16xf32>
    %cst_6 = arith.constant 0.000000e+00 : f32
    %20 = vector.broadcast %cst_6 : f32 to vector<1x16xf32>
    %21 = arith.maximumf %19, %20 : vector<1x16xf32>
    %cst_7 = arith.constant 9.99999974E-6 : f32
    %22 = vector.broadcast %cst_7 : f32 to vector<1x16xf32>
    %23 = arith.addf %21, %22 : vector<1x16xf32>
    %24 = math.rsqrt %23 : vector<1x16xf32>
    %25 = arith.mulf %8, %24 : vector<1x16xf32>
    %26 = vector.broadcast %25 : vector<1x16xf32> to vector<8x16xf32>
    %27 = arith.mulf %7, %26 : vector<8x16xf32>
    %28 = arith.mulf %16, %25 : vector<1x16xf32>
    %29 = arith.subf %9, %28 : vector<1x16xf32>
    %30 = vector.broadcast %29 : vector<1x16xf32> to vector<8x16xf32>
    %31 = arith.addf %27, %30 : vector<8x16xf32>
    %32 = arith.mulf %31, %3 : vector<8x16xf32>
    %cst_8 = arith.constant dense<0xFF800000> : vector<8xf32>
    %33 = vector.multi_reduction <maximumf>, %32, %cst_8 [1] : vector<8x16xf32> to vector<8xf32>
    %34 = vector.shape_cast %33 : vector<8xf32> to vector<8x1xf32>
    %35 = vector.broadcast %34 : vector<8x1xf32> to vector<8x16xf32>
    %36 = arith.subf %32, %35 : vector<8x16xf32>
    %37 = vector.shape_cast %36 : vector<8x16xf32> to vector<8x16x1xf32>
    %38 = vector.shape_cast %36 : vector<8x16xf32> to vector<8x1x16xf32>
    %39 = tpu.iota {dimensions = array<i32: 1>} : vector<1x16x16xi32>
    %40 = tpu.iota {dimensions = array<i32: 2>} : vector<1x16x16xi32>
    %41 = vector.broadcast %38 : vector<8x1x16xf32> to vector<8x16x16xf32>
    %42 = vector.broadcast %37 : vector<8x16x1xf32> to vector<8x16x16xf32>
    %43 = arith.cmpf ogt, %41, %42 : vector<8x16x16xf32>
    %44 = vector.broadcast %38 : vector<8x1x16xf32> to vector<8x16x16xf32>
    %45 = vector.broadcast %37 : vector<8x16x1xf32> to vector<8x16x16xf32>
    %46 = arith.cmpf oeq, %44, %45 : vector<8x16x16xf32>
    %47 = arith.cmpi sle, %40, %39 : vector<1x16x16xi32>
    %48 = vector.broadcast %47 : vector<1x16x16xi1> to vector<8x16x16xi1>
    %49 = arith.andi %46, %48 : vector<8x16x16xi1>
    %50 = arith.ori %43, %49 : vector<8x16x16xi1>
    %51 = arith.extui %50 : vector<8x16x16xi1> to vector<8x16x16xi32>
    %52 = arith.sitofp %51 : vector<8x16x16xi32> to vector<8x16x16xf32>
    %53 = vector.broadcast %38 : vector<8x1x16xf32> to vector<8x16x16xf32>
    %54 = arith.mulf %52, %53 : vector<8x16x16xf32>
    %55 = tpu.concatenate %52, %54 in 1 : vector<8x16x16xf32>, vector<8x16x16xf32> -> vector<8x32x16xf32>
    %cst_9 = arith.constant dense<0.000000e+00> : vector<8x32xf32>
    %56 = vector.multi_reduction <add>, %55, %cst_9 [2] : vector<8x32x16xf32> to vector<8x32xf32>
    %57 = vector.extract_strided_slice %56 {offsets = [0, 0], sizes = [8, 16], strides = [1, 1]} : vector<8x32xf32> to vector<8x16xf32>
    %58 = vector.extract_strided_slice %56 {offsets = [0, 16], sizes = [8, 16], strides = [1, 1]} : vector<8x32xf32> to vector<8x16xf32>
    %cst_10 = arith.constant 1.000000e+00 : f32
    %59 = vector.broadcast %cst_10 : f32 to vector<8x16xf32>
    %60 = arith.subf %58, %59 : vector<8x16xf32>
    %61 = arith.mulf %57, %36 : vector<8x16xf32>
    %62 = arith.cmpf ogt, %61, %60 : vector<8x16xf32>
    %63 = arith.divf %60, %57 : vector<8x16xf32>
    %cst_11 = arith.constant 0xFF800000 : f32
    %64 = vector.broadcast %cst_11 : f32 to vector<8x16xf32>
    %65 = arith.select %62, %63, %64 : vector<8x16xi1>, vector<8x16xf32>
    %cst_12 = arith.constant dense<0xFF800000> : vector<8xf32>
    %66 = vector.multi_reduction <maximumf>, %65, %cst_12 [1] : vector<8x16xf32> to vector<8xf32>
    %67 = vector.shape_cast %66 : vector<8xf32> to vector<8x1xf32>
    %68 = vector.broadcast %67 : vector<8x1xf32> to vector<8x16xf32>
    %69 = arith.subf %36, %68 : vector<8x16xf32>
    %cst_13 = arith.constant 0.000000e+00 : f32
    %70 = vector.broadcast %cst_13 : f32 to vector<8x16xf32>
    %71 = arith.maximumf %69, %70 : vector<8x16xf32>
    %cst_14 = arith.constant 0.000000e+00 : f32
    %72 = vector.broadcast %cst_14 : f32 to vector<8x16xf32>
    %73 = arith.subf %72, %71 : vector<8x16xf32>
    %cst_15 = arith.constant 1.000000e-10 : f32
    %74 = vector.broadcast %cst_15 : f32 to vector<8x16xf32>
    %75 = arith.addf %71, %74 : vector<8x16xf32>
    %76 = math.log %75 : vector<8x16xf32>
    %77 = arith.mulf %73, %76 : vector<8x16xf32>
    %cst_16 = arith.constant 0.000000e+00 : f32
    %78 = vector.broadcast %cst_16 : f32 to vector<1x128xf32>
    %79 = vector.shape_cast %77 : vector<8x16xf32> to vector<1x8x16xf32>
    %cst_17 = arith.constant dense<0.000000e+00> : vector<1xf32>
    %80 = vector.multi_reduction <add>, %79, %cst_17 [1, 2] : vector<1x8x16xf32> to vector<1xf32>
    %81 = vector.shape_cast %80 : vector<1xf32> to vector<1x1x1xf32>
    %82 = vector.extract %81[0, 0, 0] : f32 from vector<1x1x1xf32>
    %83 = vector.broadcast %82 : f32 to vector<1x128xf32>
    %84 = arith.addf %78, %83 : vector<1x128xf32>
    %c0_18 = arith.constant 0 : index
    %c0_19 = arith.constant 0 : index
    %85 = vector.load %arg4[%c0_18, %c0_19] : memref<1x128xf32, #tpu.memory_space<vmem>>, vector<1x128xf32>
    tpu.vector_store %arg4[%c0_18, %c0_19], %84 {strides = array<i32>} : memref<1x128xf32, #tpu.memory_space<vmem>>, vector<1x128xf32>,
    %86 = arith.mulf %2, %71 : vector<8x16xf32>
    %c8 = arith.constant 8 : index
    %c0_20 = arith.constant 0 : index
    %87 = vector.load %arg2[%c8, %c0_20] : memref<88x32xf32, #tpu.memory_space<vmem>>, vector<16x32xf32>
    %88 = vector.extract_strided_slice %4 {offsets = [2, 0], sizes = [1, 32], strides = [1, 1]} : vector<16x32xf32> to vector<1x32xf32>
    %89 = vector.extract_strided_slice %4 {offsets = [3, 0], sizes = [1, 32], strides = [1, 1]} : vector<16x32xf32> to vector<1x32xf32>
    %cst_21 = arith.constant dense<0.000000e+00> : vector<8x32xf32>
    %90 = tpu.matmul %86, %87, %cst_21 {dimension_numbers = #tpu.dot_dimension_numbers<[1], [0], [0], [1], [0, 0, 1, 1], [], []>} : vector<8x16xf32>, vector<16x32xf32>, vector<8x32xf32> -> vector<8x32xf32>
    %91 = arith.mulf %90, %90 : vector<8x32xf32>
    %92 = tpu.concatenate %90, %91 in 1 : vector<8x32xf32>, vector<8x32xf32> -> vector<8x64xf32>
    %cst_22 = arith.constant dense<0.000000e+00> : vector<64xf32>
    %93 = vector.multi_reduction <add>, %92, %cst_22 [0] : vector<8x64xf32> to vector<64xf32>
    %94 = vector.shape_cast %93 : vector<64xf32> to vector<1x64xf32>
    %cst_23 = arith.constant 1.250000e-01 : f32
    %95 = vector.broadcast %cst_23 : f32 to vector<1x64xf32>
    %96 = arith.mulf %94, %95 : vector<1x64xf32>
    %97 = vector.extract_strided_slice %96 {offsets = [0, 0], sizes = [1, 32], strides = [1, 1]} : vector<1x64xf32> to vector<1x32xf32>
    %98 = vector.extract_strided_slice %96 {offsets = [0, 32], sizes = [1, 32], strides = [1, 1]} : vector<1x64xf32> to vector<1x32xf32>
    %99 = arith.mulf %97, %97 : vector<1x32xf32>
    %100 = arith.subf %98, %99 : vector<1x32xf32>
    %cst_24 = arith.constant 0.000000e+00 : f32
    %101 = vector.broadcast %cst_24 : f32 to vector<1x32xf32>
    %102 = arith.maximumf %100, %101 : vector<1x32xf32>
    %cst_25 = arith.constant 9.99999974E-6 : f32
    %103 = vector.broadcast %cst_25 : f32 to vector<1x32xf32>
    %104 = arith.addf %102, %103 : vector<1x32xf32>
    %105 = math.rsqrt %104 : vector<1x32xf32>
    %106 = arith.mulf %88, %105 : vector<1x32xf32>
    %107 = vector.broadcast %106 : vector<1x32xf32> to vector<8x32xf32>
    %108 = arith.mulf %90, %107 : vector<8x32xf32>
    %109 = arith.mulf %97, %106 : vector<1x32xf32>
    %110 = arith.subf %89, %109 : vector<1x32xf32>
    %111 = vector.broadcast %110 : vector<1x32xf32> to vector<8x32xf32>
    %112 = arith.addf %108, %111 : vector<8x32xf32>
    %113 = vector.extract_strided_slice %112 {offsets = [0, 0], sizes = [8, 16], strides = [1, 1]} : vector<8x32xf32> to vector<8x16xf32>
    %114 = vector.extract_strided_slice %112 {offsets = [0, 16], sizes = [8, 16], strides = [1, 1]} : vector<8x32xf32> to vector<8x16xf32>
    %115 = arith.negf %114 : vector<8x16xf32>
    %116 = math.exp %115 : vector<8x16xf32>
    %cst_26 = arith.constant 1.000000e+00 : f32
    %117 = vector.broadcast %cst_26 : f32 to vector<8x16xf32>
    %118 = arith.addf %117, %116 : vector<8x16xf32>
    %119 = arith.divf %117, %118 : vector<8x16xf32>
    %120 = arith.mulf %113, %119 : vector<8x16xf32>
    %c24 = arith.constant 24 : index
    %c0_27 = arith.constant 0 : index
    %121 = vector.load %arg2[%c24, %c0_27] : memref<88x32xf32, #tpu.memory_space<vmem>>, vector<16x32xf32>
    %122 = vector.extract_strided_slice %4 {offsets = [4, 0], sizes = [1, 32], strides = [1, 1]} : vector<16x32xf32> to vector<1x32xf32>
    %123 = vector.extract_strided_slice %4 {offsets = [5, 0], sizes = [1, 32], strides = [1, 1]} : vector<16x32xf32> to vector<1x32xf32>
    %cst_28 = arith.constant dense<0.000000e+00> : vector<8x32xf32>
    %124 = tpu.matmul %120, %121, %cst_28 {dimension_numbers = #tpu.dot_dimension_numbers<[1], [0], [0], [1], [0, 0, 1, 1], [], []>} : vector<8x16xf32>, vector<16x32xf32>, vector<8x32xf32> -> vector<8x32xf32>
    %125 = arith.mulf %124, %124 : vector<8x32xf32>
    %126 = tpu.concatenate %124, %125 in 1 : vector<8x32xf32>, vector<8x32xf32> -> vector<8x64xf32>
    %cst_29 = arith.constant dense<0.000000e+00> : vector<64xf32>
    %127 = vector.multi_reduction <add>, %126, %cst_29 [0] : vector<8x64xf32> to vector<64xf32>
    %128 = vector.shape_cast %127 : vector<64xf32> to vector<1x64xf32>
    %cst_30 = arith.constant 1.250000e-01 : f32
    %129 = vector.broadcast %cst_30 : f32 to vector<1x64xf32>
    %130 = arith.mulf %128, %129 : vector<1x64xf32>
    %131 = vector.extract_strided_slice %130 {offsets = [0, 0], sizes = [1, 32], strides = [1, 1]} : vector<1x64xf32> to vector<1x32xf32>
    %132 = vector.extract_strided_slice %130 {offsets = [0, 32], sizes = [1, 32], strides = [1, 1]} : vector<1x64xf32> to vector<1x32xf32>
    %133 = arith.mulf %131, %131 : vector<1x32xf32>
    %134 = arith.subf %132, %133 : vector<1x32xf32>
    %cst_31 = arith.constant 0.000000e+00 : f32
    %135 = vector.broadcast %cst_31 : f32 to vector<1x32xf32>
    %136 = arith.maximumf %134, %135 : vector<1x32xf32>
    %cst_32 = arith.constant 9.99999974E-6 : f32
    %137 = vector.broadcast %cst_32 : f32 to vector<1x32xf32>
    %138 = arith.addf %136, %137 : vector<1x32xf32>
    %139 = math.rsqrt %138 : vector<1x32xf32>
    %140 = arith.mulf %122, %139 : vector<1x32xf32>
    %141 = vector.broadcast %140 : vector<1x32xf32> to vector<8x32xf32>
    %142 = arith.mulf %124, %141 : vector<8x32xf32>
    %143 = arith.mulf %131, %140 : vector<1x32xf32>
    %144 = arith.subf %123, %143 : vector<1x32xf32>
    %145 = vector.broadcast %144 : vector<1x32xf32> to vector<8x32xf32>
    %146 = arith.addf %142, %145 : vector<8x32xf32>
    %147 = vector.extract_strided_slice %146 {offsets = [0, 0], sizes = [8, 16], strides = [1, 1]} : vector<8x32xf32> to vector<8x16xf32>
    %148 = vector.extract_strided_slice %146 {offsets = [0, 16], sizes = [8, 16], strides = [1, 1]} : vector<8x32xf32> to vector<8x16xf32>
    %149 = arith.negf %148 : vector<8x16xf32>
    %150 = math.exp %149 : vector<8x16xf32>
    %cst_33 = arith.constant 1.000000e+00 : f32
    %151 = vector.broadcast %cst_33 : f32 to vector<8x16xf32>
    %152 = arith.addf %151, %150 : vector<8x16xf32>
    %153 = arith.divf %151, %152 : vector<8x16xf32>
    %154 = arith.mulf %147, %153 : vector<8x16xf32>
    %155 = arith.addf %120, %154 : vector<8x16xf32>
    %cst_34 = arith.constant 0.707106769 : f32
    %156 = vector.broadcast %cst_34 : f32 to vector<8x16xf32>
    %157 = arith.mulf %155, %156 : vector<8x16xf32>
    %c40 = arith.constant 40 : index
    %c0_35 = arith.constant 0 : index
    %158 = vector.load %arg2[%c40, %c0_35] : memref<88x32xf32, #tpu.memory_space<vmem>>, vector<16x32xf32>
    %159 = vector.extract_strided_slice %4 {offsets = [6, 0], sizes = [1, 32], strides = [1, 1]} : vector<16x32xf32> to vector<1x32xf32>
    %160 = vector.extract_strided_slice %4 {offsets = [7, 0], sizes = [1, 32], strides = [1, 1]} : vector<16x32xf32> to vector<1x32xf32>
    %cst_36 = arith.constant dense<0.000000e+00> : vector<8x32xf32>
    %161 = tpu.matmul %157, %158, %cst_36 {dimension_numbers = #tpu.dot_dimension_numbers<[1], [0], [0], [1], [0, 0, 1, 1], [], []>} : vector<8x16xf32>, vector<16x32xf32>, vector<8x32xf32> -> vector<8x32xf32>
    %162 = arith.mulf %161, %161 : vector<8x32xf32>
    %163 = tpu.concatenate %161, %162 in 1 : vector<8x32xf32>, vector<8x32xf32> -> vector<8x64xf32>
    %cst_37 = arith.constant dense<0.000000e+00> : vector<64xf32>
    %164 = vector.multi_reduction <add>, %163, %cst_37 [0] : vector<8x64xf32> to vector<64xf32>
    %165 = vector.shape_cast %164 : vector<64xf32> to vector<1x64xf32>
    %cst_38 = arith.constant 1.250000e-01 : f32
    %166 = vector.broadcast %cst_38 : f32 to vector<1x64xf32>
    %167 = arith.mulf %165, %166 : vector<1x64xf32>
    %168 = vector.extract_strided_slice %167 {offsets = [0, 0], sizes = [1, 32], strides = [1, 1]} : vector<1x64xf32> to vector<1x32xf32>
    %169 = vector.extract_strided_slice %167 {offsets = [0, 32], sizes = [1, 32], strides = [1, 1]} : vector<1x64xf32> to vector<1x32xf32>
    %170 = arith.mulf %168, %168 : vector<1x32xf32>
    %171 = arith.subf %169, %170 : vector<1x32xf32>
    %cst_39 = arith.constant 0.000000e+00 : f32
    %172 = vector.broadcast %cst_39 : f32 to vector<1x32xf32>
    %173 = arith.maximumf %171, %172 : vector<1x32xf32>
    %cst_40 = arith.constant 9.99999974E-6 : f32
    %174 = vector.broadcast %cst_40 : f32 to vector<1x32xf32>
    %175 = arith.addf %173, %174 : vector<1x32xf32>
    %176 = math.rsqrt %175 : vector<1x32xf32>
    %177 = arith.mulf %159, %176 : vector<1x32xf32>
    %178 = vector.broadcast %177 : vector<1x32xf32> to vector<8x32xf32>
    %179 = arith.mulf %161, %178 : vector<8x32xf32>
    %180 = arith.mulf %168, %177 : vector<1x32xf32>
    %181 = arith.subf %160, %180 : vector<1x32xf32>
    %182 = vector.broadcast %181 : vector<1x32xf32> to vector<8x32xf32>
    %183 = arith.addf %179, %182 : vector<8x32xf32>
    %184 = vector.extract_strided_slice %183 {offsets = [0, 0], sizes = [8, 16], strides = [1, 1]} : vector<8x32xf32> to vector<8x16xf32>
    %185 = vector.extract_strided_slice %183 {offsets = [0, 16], sizes = [8, 16], strides = [1, 1]} : vector<8x32xf32> to vector<8x16xf32>
    %186 = arith.negf %185 : vector<8x16xf32>
    %187 = math.exp %186 : vector<8x16xf32>
    %cst_41 = arith.constant 1.000000e+00 : f32
    %188 = vector.broadcast %cst_41 : f32 to vector<8x16xf32>
    %189 = arith.addf %188, %187 : vector<8x16xf32>
    %190 = arith.divf %188, %189 : vector<8x16xf32>
    %191 = arith.mulf %184, %190 : vector<8x16xf32>
    %192 = arith.addf %157, %191 : vector<8x16xf32>
    %cst_42 = arith.constant 0.707106769 : f32
    %193 = vector.broadcast %cst_42 : f32 to vector<8x16xf32>
    %194 = arith.mulf %192, %193 : vector<8x16xf32>
    %c56 = arith.constant 56 : index
    %c0_43 = arith.constant 0 : index
    %195 = vector.load %arg2[%c56, %c0_43] : memref<88x32xf32, #tpu.memory_space<vmem>>, vector<16x32xf32>
    %196 = vector.extract_strided_slice %4 {offsets = [8, 0], sizes = [1, 32], strides = [1, 1]} : vector<16x32xf32> to vector<1x32xf32>
    %197 = vector.extract_strided_slice %4 {offsets = [9, 0], sizes = [1, 32], strides = [1, 1]} : vector<16x32xf32> to vector<1x32xf32>
    %cst_44 = arith.constant dense<0.000000e+00> : vector<8x32xf32>
    %198 = tpu.matmul %194, %195, %cst_44 {dimension_numbers = #tpu.dot_dimension_numbers<[1], [0], [0], [1], [0, 0, 1, 1], [], []>} : vector<8x16xf32>, vector<16x32xf32>, vector<8x32xf32> -> vector<8x32xf32>
    %199 = arith.mulf %198, %198 : vector<8x32xf32>
    %200 = tpu.concatenate %198, %199 in 1 : vector<8x32xf32>, vector<8x32xf32> -> vector<8x64xf32>
    %cst_45 = arith.constant dense<0.000000e+00> : vector<64xf32>
    %201 = vector.multi_reduction <add>, %200, %cst_45 [0] : vector<8x64xf32> to vector<64xf32>
    %202 = vector.shape_cast %201 : vector<64xf32> to vector<1x64xf32>
    %cst_46 = arith.constant 1.250000e-01 : f32
    %203 = vector.broadcast %cst_46 : f32 to vector<1x64xf32>
    %204 = arith.mulf %202, %203 : vector<1x64xf32>
    %205 = vector.extract_strided_slice %204 {offsets = [0, 0], sizes = [1, 32], strides = [1, 1]} : vector<1x64xf32> to vector<1x32xf32>
    %206 = vector.extract_strided_slice %204 {offsets = [0, 32], sizes = [1, 32], strides = [1, 1]} : vector<1x64xf32> to vector<1x32xf32>
    %207 = arith.mulf %205, %205 : vector<1x32xf32>
    %208 = arith.subf %206, %207 : vector<1x32xf32>
    %cst_47 = arith.constant 0.000000e+00 : f32
    %209 = vector.broadcast %cst_47 : f32 to vector<1x32xf32>
    %210 = arith.maximumf %208, %209 : vector<1x32xf32>
    %cst_48 = arith.constant 9.99999974E-6 : f32
    %211 = vector.broadcast %cst_48 : f32 to vector<1x32xf32>
    %212 = arith.addf %210, %211 : vector<1x32xf32>
    %213 = math.rsqrt %212 : vector<1x32xf32>
    %214 = arith.mulf %196, %213 : vector<1x32xf32>
    %215 = vector.broadcast %214 : vector<1x32xf32> to vector<8x32xf32>
    %216 = arith.mulf %198, %215 : vector<8x32xf32>
    %217 = arith.mulf %205, %214 : vector<1x32xf32>
    %218 = arith.subf %197, %217 : vector<1x32xf32>
    %219 = vector.broadcast %218 : vector<1x32xf32> to vector<8x32xf32>
    %220 = arith.addf %216, %219 : vector<8x32xf32>
    %221 = vector.extract_strided_slice %220 {offsets = [0, 0], sizes = [8, 16], strides = [1, 1]} : vector<8x32xf32> to vector<8x16xf32>
    %222 = vector.extract_strided_slice %220 {offsets = [0, 16], sizes = [8, 16], strides = [1, 1]} : vector<8x32xf32> to vector<8x16xf32>
    %223 = arith.negf %222 : vector<8x16xf32>
    %224 = math.exp %223 : vector<8x16xf32>
    %cst_49 = arith.constant 1.000000e+00 : f32
    %225 = vector.broadcast %cst_49 : f32 to vector<8x16xf32>
    %226 = arith.addf %225, %224 : vector<8x16xf32>
    %227 = arith.divf %225, %226 : vector<8x16xf32>
    %228 = arith.mulf %221, %227 : vector<8x16xf32>
    %229 = arith.addf %194, %228 : vector<8x16xf32>
    %cst_50 = arith.constant 0.707106769 : f32
    %230 = vector.broadcast %cst_50 : f32 to vector<8x16xf32>
    %231 = arith.mulf %229, %230 : vector<8x16xf32>
    %c0_51 = arith.constant 0 : index
    %c0_52 = arith.constant 0 : index
    %232 = vector.load %arg3[%c0_51, %c0_52] : memref<8x16xf32, #tpu.memory_space<vmem>>, vector<8x16xf32>
    tpu.vector_store %arg3[%c0_51, %c0_52], %231 {strides = array<i32>} : memref<8x16xf32, #tpu.memory_space<vmem>>, vector<8x16xf32>,
    return
  }
  func.func @transform_0(%arg0: i32) -> (i32, i32) {
    %c0_i32 = arith.constant 0 : i32
    %c0_i32_0 = arith.constant 0 : i32
    return %arg0, %c0_i32 : i32, i32
  }
  func.func @transform_1(%arg0: i32) -> (i32, i32) {
    %c0_i32 = arith.constant 0 : i32
    %c0_i32_0 = arith.constant 0 : i32
    %c0_i32_1 = arith.constant 0 : i32
    return %c0_i32, %c0_i32_0 : i32, i32
  }
  func.func @transform_2(%arg0: i32) -> (i32, i32) {
    %c0_i32 = arith.constant 0 : i32
    %c0_i32_0 = arith.constant 0 : i32
    return %arg0, %c0_i32 : i32, i32
  }
  func.func @transform_3(%arg0: i32) -> (i32, i32) {
    %c0_i32 = arith.constant 0 : i32
    %c0_i32_0 = arith.constant 0 : i32
    return %arg0, %c0_i32 : i32, i32
  }
}

</mosaic_0001>

<bundles_post_ra>
// kernel: tpu_custom_call.1
= control target key start
LH: loop header
LB: loop body
LE: loop exit
PB: predicated region body
PF: predicated region fallthrough
CT: control target
= control target key end

     0   :  { %9 = vsyncpa [#allocation3], 0  ;;  %vm19_vm0 = vcmask 64512   ;;  %v1689_v2 = vmov 0.0   ;;  %vm1690_vm1 = vmmov 0   ;;  %s2216_s0 = inlined_call_operand.vmem [shape: f32[8,48], index: 0, kind: input, shape index: {}]   ;;  %s2217_s1 = inlined_call_operand.vmem [shape: f32[88,32], index: 1, kind: input, shape index: {}]   ;;  %s2218_s2 = inlined_call_operand.hbm [shape: f32[8,16], index: 2, kind: output, shape index: {0}]   ;;  %s2219_s3 = inlined_call_operand.hbm [shape: f32[1,128], index: 3, kind: output, shape index: {1}]  }
   0x1   :  { %v18_v0 = vld [vmem:[%s2217_s1] sm:$0xff]  ;;  %1536 = vmatprep.subr.mxu0 %v1689_v2  ;;  %1538 = vmatprep.mubr.msk.f32.mxu0 %vm1690_vm1, %v1689_v2 }
   0x2   :  { %v15_v1 = vld [vmem:[%s2216_s0] sm:$0xff] }
   0x3   :  { %10 = vsyncpa [#allocation5], 0  ;;  %1537 = vmatpush3.msra.mxu0 %v18_v0  ;;  %1541 = vmatprep.subr.mxu1 %v1689_v2  ;;  %s1691_s16 = smov 16   ;;  %vm98_vm2 = vcmask 130048   ;;  %vm100_vm3 = vcmask 261120   ;;  %s1692_s17 = smov 112   ;;  %v123_v22 = vlaneseq }
   0x4   :  { %1539 = vmatmul.mubr.msk.f32.vlgmr.msra.gmra.mxu0 %vm19_vm0, %v15_v1  ;;  %1545 = vmatprep.mubr.msk.f32.mxu1 %vm1690_vm1, %v1689_v2  ;;  %s1693_s18 = smov 96   ;;  %v16_v24 = vld [vmem:[%s2217_s1 + $0x48] sm:$0xff]  ;;  %v1694_v55 = vmov 1966171168   ;;  %s1696_s27 = smov 32  }
   0x5   :  { %1548 = vmatprep.subr.mxu0 %v1689_v2  ;;  %1552 = vmatprep.mubr.msk.f32.mxu0 %vm1690_vm1, %v1689_v2  ;;  %v1741_v23 = vshrl.u32 %v123_v22, 7  ;;  %v237_v56 = vunpack.c.l.s4 %v1694_v55  ;;  %v1796_v61 = vand.u32 127, %v123_v22 }
   0x7   :  { %v1747_v26 = vsub.s32 0, %v1741_v23  ;;  %v1751_v31 = vsub.s32 1, %v1741_v23  ;;  %v192_v39 = vsub.s32 4, %v1741_v23  ;;  %v225_v44 = vsub.s32 7, %v1741_v23 }
   0x8   :  { %v170_v47 = vsub.s32 2, %v1741_v23  ;;  %v181_v49 = vsub.s32 3, %v1741_v23  ;;  %v203_v51 = vsub.s32 5, %v1741_v23  ;;  %v214_v53 = vsub.s32 6, %v1741_v23 }
   0x9   :  { %v238_v57 = vunpack.c.0.s8 %v237_v56  ;;  %vm1803_vm4 = vcmp.le.s32.totalorder %v1796_v61, %v1741_v23 }
   0xb   :  { %v1790_v58 = vsub.s32 %v238_v57, %v1741_v23 }
  0xc4   :  { %v89_v3 = vpop.f32.mrf.mxu0 }
  0xc5   :  { %v93_v4 = vmul.f32 %v89_v3, %v89_v3 }
  0xc6   :  { %v1540_v5 = vpop.f32.mrf.mxu0 }
  0xc7   :  { %95 = vrot.lane.b32.xlu0 %v93_v4, %s1691_s16 }
 0x139   :  { %v96_v6 = vpop.permute.xlu0 %95 }
 0x13a   :  { %v99_v7 = vsel %vm98_vm2, %v89_v3, %v96_v6 }
 0x13b   :  { %v101_v8 = vsel %vm100_vm3, %v99_v7, 0.0 }
 0x13c   :  { %v102_v9 = vrot.slane %v101_v8, 4 }
 0x13e   :  { %v103_v10 = vadd.f32 %v102_v9, %v101_v8 }
 0x140   :  { %v104_v11 = vrot.slane %v103_v10, 2 }
 0x142   :  { %v105_v12 = vadd.f32 %v104_v11, %v103_v10 }
 0x144   :  { %v106_v13 = vrot.slane %v105_v12, 1 }
 0x146   :  { %v107_v14 = vadd.f32 %v106_v13, %v105_v12 }
 0x148   :  { %v108_v15 = vmul.f32 0.125, %v107_v14 }
 0x14a   :  { %v109_v16 = vmul.f32 %v108_v15, %v108_v15 }
 0x14c   :  { %111 = vrot.lane.b32.xlu0 %v109_v16, %s1691_s16 }
 0x1be   :  { %v112_v17 = vpop.permute.xlu0 %111 }
 0x1bf   :  { %v114_v18 = vsub.f32 %v108_v15, %v112_v17 }
 0x1c1   :  { %v115_v19 = vmax.f32 %v114_v18, 0.0 }
 0x1c3   :  { %v116_v20 = vadd.f32 1e-05, %v115_v19 }
 0x1c5   :  { %1583 = vrsqrt.f32 %v116_v20 }
 0x1d2   :  { %v1584_v21 = vpop.eup %1583 }
 0x1d3   :  { %119 = vrot.lane.b32.xlu1 %v1584_v21, %s1692_s17 }
 0x1d7   :  { %138 = vrot.lane.b32.xlu1 %v15_v1, %s1693_s18 }
 0x245   :  { %v120_v25 = vpop.permute.xlu1 %119 }
 0x246   :  { %v122_v27 = vmul.f32 %v120_v25, %v16_v24 }
 0x248   :  { %v128_v28 = vmul.f32 %v122_v27, %v108_v15  ;;  %v126_v29 = vrot.slane %v122_v27, %v1747_v26 }
 0x249   :  { %v139_v35 = vpop.permute.xlu1 %138 }
 0x24a   :  { %v130_v30 = vrot.slane %v128_v28, 7  ;;  %v127_v33 = vmul.f32 %v126_v29, %v89_v3  ;;  %v286_v3 = vadd.s32 8, %v1741_v23 }
 0x24c   :  { %v132_v32 = vsub.f32 %v16_v24, %v130_v30  ;;  %vm1816_vm8 = vcmp.le.s32.totalorder %v1796_v61, %v286_v3 }
 0x24e   :  { %v136_v34 = vrot.slane %v132_v32, %v1751_v31 }
 0x250   :  { %v137_v36 = vadd.f32 %v136_v34, %v127_v33 }
 0x252   :  { %v141_v37 = vmul.f32 %v139_v35, %v137_v36 }
 0x254   :  { %v142_v38 = vsel %vm98_vm2, %v141_v37, -inf }
 0x255   :  { %143 = vmax.xlane.f32.xlu0 %v142_v38 }
 0x2de   :  { %v144_v40 = vpop.xlane.xlu0 %143 }
 0x2df   :  { %v1756_v41 = vsub.f32 %v141_v37, %v144_v40 }
 0x2e1   :  { %v193_v42 = vrot.slane %v1756_v41, %v192_v39  ;;  %v149_v43 = vrot.slane %v1756_v41, %v1747_v26  ;;  %v1767_v45 = vrot.slane %v1756_v41, %v225_v44  ;;  %v160_v46 = vrot.slane %v1756_v41, %v1751_v31 }
 0x2e2   :  { %v171_v48 = vrot.slane %v1756_v41, %v170_v47  ;;  %v182_v50 = vrot.slane %v1756_v41, %v181_v49  ;;  %v204_v52 = vrot.slane %v1756_v41, %v203_v51  ;;  %v215_v54 = vrot.slane %v1756_v41, %v214_v53 }
 0x2e3   :  { %195 = vbcast.lane.b32.xlu0 %v193_v42, 256  ;;  %151 = vbcast.lane.b32.xlu1 %v149_v43, 256  ;;  %v242_v59 = vrot.slane %v1756_v41, %v1790_v58  ;;  %v235_v5 = vcombine.high %v1756_v41, %v1756_v41 }
 0x2e5   :  { %v258_v60 = vrot.slane %v242_v59, %v1790_v58  ;;  %v250_v63 = vcombine.high %v242_v59, %v242_v59  ;;  %v1833_v11 = vrot.slane %v235_v5, %v1790_v58 }
 0x2e7   :  { %232 = vbcast.lane.b32.xlu0 %v1767_v45, 264  ;;  %155 = vbcast.lane.b32.xlu1 %v149_v43, 264  ;;  %v1799_v62 = vrot.slane %v258_v60, %v1747_v26  ;;  %v272_v4 = vrot.slane %v250_v63, %v1790_v58  ;;  %v280_v15 = vcombine.high %v258_v60, %v258_v60 }
 0x2e8   :  { %v1846_v16 = vrot.slane %v1833_v11, %v1790_v58  ;;  %v251_v37 = vcombine.high %v1833_v11, %v1833_v11 }
 0x2e9   :  { %v1828_v10 = vrot.slane %v272_v4, %v1747_v26  ;;  %v1858_v21 = vrot.slane %v280_v15, %v1747_v26  ;;  %v282_v28 = vcombine.high %v272_v4, %v272_v4 }
 0x2ea   :  { %v1862_v22 = vrot.slane %v1846_v16, %v1747_v26  ;;  %v281_v63 = vcombine.high %v1846_v16, %v1846_v16 }
 0x2eb   :  { %568 = vbcast.lane.b32.xlu0 %v149_v43, 264  ;;  %162 = vbcast.lane.b32.xlu1 %v160_v46, 256  ;;  %v1887_v33 = vrot.slane %v282_v28, %v1747_v26 }
 0x2ef   :  { %590 = vbcast.lane.b32.xlu0 %v171_v48, 264  ;;  %166 = vbcast.lane.b32.xlu1 %v160_v46, 264 }
 0x2f3   :  { %601 = vbcast.lane.b32.xlu0 %v182_v50, 264  ;;  %173 = vbcast.lane.b32.xlu1 %v171_v48, 256 }
 0x2f7   :  { %612 = vbcast.lane.b32.xlu0 %v193_v42, 264  ;;  %177 = vbcast.lane.b32.xlu1 %v171_v48, 264 }
 0x2fb   :  { %623 = vbcast.lane.b32.xlu0 %v204_v52, 264  ;;  %184 = vbcast.lane.b32.xlu1 %v182_v50, 256 }
 0x2ff   :  { %634 = vbcast.lane.b32.xlu0 %v215_v54, 264  ;;  %188 = vbcast.lane.b32.xlu1 %v182_v50, 264 }
 0x303   :  { %199 = vbcast.lane.b32.xlu1 %v193_v42, 264 }
 0x307   :  { %206 = vbcast.lane.b32.xlu1 %v204_v52, 256 }
 0x30b   :  { %210 = vbcast.lane.b32.xlu1 %v204_v52, 264 }
 0x30f   :  { %217 = vbcast.lane.b32.xlu1 %v215_v54, 256 }
 0x313   :  { %221 = vbcast.lane.b32.xlu1 %v215_v54, 264 }
 0x317   :  { %228 = vbcast.lane.b32.xlu1 %v1767_v45, 256 }
 0x31b   :  { %564 = vbcast.lane.b32.xlu1 %v149_v43, 256 }
 0x31f   :  { %575 = vbcast.lane.b32.xlu1 %v160_v46, 256 }
 0x323   :  { %579 = vbcast.lane.b32.xlu1 %v160_v46, 264  ;;  %v279_v46 = vrot.slane %v251_v37, %v1790_v58 }
 0x325   :  { %v1925_v55 = vrot.slane %v279_v46, %v1747_v26  ;;  %v283_v56 = vcombine.high %v279_v46, %v279_v46 }
 0x327   :  { %586 = vbcast.lane.b32.xlu1 %v171_v48, 256 }
 0x32b   :  { %597 = vbcast.lane.b32.xlu1 %v182_v50, 256 }
 0x32f   :  { %608 = vbcast.lane.b32.xlu1 %v193_v42, 256 }
 0x333   :  { %619 = vbcast.lane.b32.xlu1 %v204_v52, 256 }
 0x337   :  { %630 = vbcast.lane.b32.xlu1 %v215_v54, 256 }
 0x355   :  { %v152_v1 = vpop.permute.xlu1 %151  ;;  %v196_v20 = vpop.permute.xlu0 %195 }
 0x356   :  { %vm345_vm5 = vcmp.eq.f32.partialorder %v1799_v62, %v152_v1  ;;  %vm329_vm6 = vcmp.gt.f32.partialorder %v1799_v62, %v152_v1  ;;  %v1939_v1 = vrot.slane %v283_v56, %v1747_v26 }
 0x357   :  { %vm367_vm7 = vmand %vm345_vm5, %vm1803_vm4 }
 0x358   :  { %vm383_vm9 = vmor %vm329_vm6, %vm367_vm7 }
 0x359   :  { %v156_v7 = vpop.permute.xlu1 %155  ;;  %v1822_v8 = vsel %vm383_vm9, 1.0, %v1689_v2  ;;  %v233_v60 = vpop.permute.xlu0 %232 }
 0x35a   :  { %vm346_vm10 = vcmp.eq.f32.partialorder %v1799_v62, %v156_v7  ;;  %v447_v9 = vsel %vm98_vm2, %v1822_v8, 0.0  ;;  %vm330_vm11 = vcmp.gt.f32.partialorder %v1799_v62, %v156_v7  ;;  %v1952_v7 = vrot.slane %v281_v63, %v1747_v26 }
 0x35b   :  { %448 = vadd.xlane.f32.xlu1 %v447_v9  ;;  %vm368_vm12 = vmand %vm346_vm10, %vm1816_vm8 }
 0x35c   :  { %vm384_vm13 = vmor %vm330_vm11, %vm368_vm12 }
 0x35d   :  { %v163_v12 = vpop.permute.xlu1 %162  ;;  %v1837_v13 = vsel %vm384_vm13, 1.0, %v1689_v2  ;;  %vm353_vm13 = vcmp.eq.f32.partialorder %v1862_v22, %v196_v20 }
 0x35e   :  { %vm347_vm14 = vcmp.eq.f32.partialorder %v1828_v10, %v163_v12  ;;  %vm331_vm15 = vcmp.gt.f32.partialorder %v1828_v10, %v163_v12  ;;  %v450_v14 = vsel %vm98_vm2, %v1837_v13, 0.0 }
 0x35f   :  { %vm369_vm0 = vmand %vm347_vm14, %vm1803_vm4  ;;  %451 = vadd.xlane.f32.xlu0 %v450_v14 }
 0x360   :  { %vm385_vm5 = vmor %vm331_vm15, %vm369_vm0 }
 0x361   :  { %v167_v17 = vpop.permute.xlu1 %166  ;;  %v1849_v18 = vsel %vm385_vm5, 1.0, %v1689_v2  ;;  %vm375_vm0 = vmand %vm353_vm13, %vm1803_vm4 }
 0x362   :  { %vm348_vm6 = vcmp.eq.f32.partialorder %v1828_v10, %v167_v17  ;;  %v459_v19 = vsel %vm98_vm2, %v1849_v18, 0.0  ;;  %vm332_vm7 = vcmp.gt.f32.partialorder %v1828_v10, %v167_v17  ;;  %v433_v37 = vmul.f32 %v1849_v18, %v1828_v10 }
 0x363   :  { %vm370_vm9 = vmand %vm348_vm6, %vm1816_vm8  ;;  %460 = vadd.xlane.f32.xlu0 %v459_v19 }
 0x364   :  { %vm386_vm10 = vmor %vm332_vm7, %vm370_vm9  ;;  %vm337_vm7 = vcmp.gt.f32.partialorder %v1862_v22, %v196_v20 }
 0x365   :  { %v174_v24 = vpop.permute.xlu1 %173  ;;  %v1865_v25 = vsel %vm386_vm10, 1.0, %v1689_v2  ;;  %vm391_vm13 = vmor %vm337_vm7, %vm375_vm0 }
 0x366   :  { %vm349_vm11 = vcmp.eq.f32.partialorder %v1858_v21, %v174_v24  ;;  %v462_v27 = vsel %vm98_vm2, %v1865_v25, 0.0  ;;  %vm333_vm12 = vcmp.gt.f32.partialorder %v1858_v21, %v174_v24  ;;  %v1908_v43 = vsel %vm391_vm13, 1.0, %v1689_v2 }
 0x367   :  { %vm371_vm14 = vmand %vm349_vm11, %vm1803_vm4  ;;  %463 = vadd.xlane.f32.xlu0 %v462_v27  ;;  %v495_v52 = vsel %vm98_vm2, %v1908_v43, 0.0 }
 0x368   :  { %vm387_vm15 = vmor %vm333_vm12, %vm371_vm14 }
 0x369   :  { %v178_v29 = vpop.permute.xlu1 %177  ;;  %v1875_v30 = vsel %vm387_vm15, 1.0, %v1689_v2 }
 0x36a   :  { %vm350_vm5 = vcmp.eq.f32.partialorder %v1858_v21, %v178_v29  ;;  %v471_v32 = vsel %vm98_vm2, %v1875_v30, 0.0  ;;  %vm334_vm6 = vcmp.gt.f32.partialorder %v1858_v21, %v178_v29  ;;  %v432_v29 = vmul.f32 %v1837_v13, %v1799_v62 }
 0x36b   :  { %472 = vadd.xlane.f32.xlu1 %v471_v32  ;;  %vm372_vm9 = vmand %vm350_vm5, %vm1816_vm8  ;;  %v431_v32 = vmul.f32 %v1822_v8, %v1799_v62  ;;  %v465_v13 = vsel %vm98_vm2, %v433_v37, 0.0  ;;  %v435_v8 = vmul.f32 %v1875_v30, %v1858_v21  ;;  %v439_v30 = vmul.f32 %v1908_v43, %v1862_v22 }
 0x36c   :  { %vm388_vm10 = vmor %vm334_vm6, %vm372_vm9  ;;  %v456_v0 = vsel %vm98_vm2, %v432_v29, 0.0 }
 0x36d   :  { %v185_v34 = vpop.permute.xlu1 %184  ;;  %v1890_v35 = vsel %vm388_vm10, 1.0, %v1689_v2 }
 0x36e   :  { %vm351_vm11 = vcmp.eq.f32.partialorder %v1887_v33, %v185_v34  ;;  %v474_v36 = vsel %vm98_vm2, %v1890_v35, 0.0  ;;  %vm335_vm12 = vcmp.gt.f32.partialorder %v1887_v33, %v185_v34  ;;  %v453_v34 = vsel %vm98_vm2, %v431_v32, 0.0 }
 0x36f   :  { %475 = vadd.xlane.f32.xlu0 %v474_v36  ;;  %vm373_vm14 = vmand %vm351_vm11, %vm1803_vm4  ;;  %v434_v36 = vmul.f32 %v1865_v25, %v1828_v10  ;;  %v436_v62 = vmul.f32 %v1890_v35, %v1858_v21  ;;  %v477_v25 = vsel %vm98_vm2, %v435_v8, 0.0 }
 0x370   :  { %vm389_vm15 = vmor %vm335_vm12, %vm373_vm14 }
 0x371   :  { %v189_v38 = vpop.permute.xlu1 %188  ;;  %v1901_v40 = vsel %vm389_vm15, 1.0, %v1689_v2 }
 0x372   :  { %vm352_vm5 = vcmp.eq.f32.partialorder %v1887_v33, %v189_v38  ;;  %v483_v42 = vsel %vm98_vm2, %v1901_v40, 0.0  ;;  %vm336_vm6 = vcmp.gt.f32.partialorder %v1887_v33, %v189_v38  ;;  %v468_v38 = vsel %vm98_vm2, %v434_v36, 0.0 }
 0x373   :  { %484 = vadd.xlane.f32.xlu1 %v483_v42  ;;  %vm374_vm0 = vmand %vm352_vm5, %vm1816_vm8  ;;  %v480_v42 = vsel %vm98_vm2, %v436_v62, 0.0  ;;  %v437_v18 = vmul.f32 %v1901_v40, %v1887_v33 }
 0x374   :  { %vm390_vm7 = vmor %vm336_vm6, %vm374_vm0 }
 0x375   :  { %v200_v48 = vpop.permute.xlu1 %199  ;;  %v1914_v50 = vsel %vm390_vm7, 1.0, %v1689_v2  ;;  %vm360_vm7 = vcmp.eq.f32.partialorder %v1939_v1, %v233_v60  ;;  %v489_v35 = vsel %vm98_vm2, %v437_v18, 0.0 }
 0x376   :  { %vm354_vm9 = vcmp.eq.f32.partialorder %v1862_v22, %v200_v48  ;;  %v486_v54 = vsel %vm98_vm2, %v1914_v50, 0.0  ;;  %vm338_vm10 = vcmp.gt.f32.partialorder %v1862_v22, %v200_v48  ;;  %v438_v10 = vmul.f32 %v1914_v50, %v1887_v33 }
 0x377   :  { %496 = vadd.xlane.f32.xlu1 %v495_v52  ;;  %487 = vadd.xlane.f32.xlu0 %v486_v54  ;;  %vm376_vm11 = vmand %vm354_vm9, %vm1816_vm8  ;;  %v501_v50 = vsel %vm98_vm2, %v439_v30, 0.0  ;;  %v1695_v52 = vmov 0  }
 0x378   :  { %vm392_vm12 = vmor %vm338_vm10, %vm376_vm11  ;;  %v492_v46 = vsel %vm98_vm2, %v438_v10, 0.0  ;;  %1582 = vset.pattern.permute.xlu0 %v1695_v52  ;;  %1581 = vset.pattern.permute.xlu1 %v1695_v52 }
 0x379   :  { %v207_v57 = vpop.permute.xlu1 %206  ;;  %v1928_v58 = vsel %vm392_vm12, 1.0, %v1689_v2  ;;  %vm382_vm11 = vmand %vm360_vm7, %vm1816_vm8 }
 0x37a   :  { %vm355_vm13 = vcmp.eq.f32.partialorder %v1925_v55, %v207_v57  ;;  %v498_v59 = vsel %vm98_vm2, %v1928_v58, 0.0  ;;  %vm339_vm14 = vcmp.gt.f32.partialorder %v1925_v55, %v207_v57  ;;  %v440_v21 = vmul.f32 %v1928_v58, %v1862_v22 }
 0x37b   :  { %499 = vadd.xlane.f32.xlu0 %v498_v59  ;;  %vm377_vm15 = vmand %vm355_vm13, %vm1803_vm4 }
 0x37c   :  { %vm393_vm5 = vmor %vm339_vm14, %vm377_vm15  ;;  %vm344_vm14 = vcmp.gt.f32.partialorder %v1939_v1, %v233_v60  ;;  %v504_v48 = vsel %vm98_vm2, %v440_v21, 0.0 }
 0x37d   :  { %v211_v3 = vpop.permute.xlu1 %210  ;;  %v1942_v4 = vsel %vm393_vm5, 1.0, %v1689_v2  ;;  %vm398_vm7 = vmor %vm344_vm14, %vm382_vm11 }
 0x37e   :  { %vm356_vm6 = vcmp.eq.f32.partialorder %v1925_v55, %v211_v3  ;;  %v507_v5 = vsel %vm98_vm2, %v1942_v4, 0.0  ;;  %vm340_vm0 = vcmp.gt.f32.partialorder %v1925_v55, %v211_v3  ;;  %v1497_v24 = vsel %vm398_vm7, 1.0, %v1689_v2  ;;  %v569_v3 = vpop.permute.xlu0 %568 }
 0x37f   :  { %508 = vadd.xlane.f32.xlu1 %v507_v5  ;;  %vm378_vm9 = vmand %vm356_vm6, %vm1816_vm8  ;;  %v534_v27 = vsel %vm98_vm2, %v1497_v24, 0.0  ;;  %v441_v40 = vmul.f32 %v1942_v4, %v1925_v55 }
 0x380   :  { %vm394_vm10 = vmor %vm340_vm0, %vm378_vm9 }
 0x381   :  { %v218_v9 = vpop.permute.xlu1 %217  ;;  %v1493_v11 = vsel %vm394_vm10, 1.0, %v1689_v2  ;;  %v513_v22 = vsel %vm98_vm2, %v441_v40, 0.0 }
 0x382   :  { %vm357_vm12 = vcmp.eq.f32.partialorder %v1952_v7, %v218_v9  ;;  %v510_v12 = vsel %vm98_vm2, %v1493_v11, 0.0  ;;  %vm341_vm13 = vcmp.gt.f32.partialorder %v1952_v7, %v218_v9  ;;  %v442_v33 = vmul.f32 %v1493_v11, %v1925_v55  ;;  %v2024_v5 = vpop.permute.xlu0 %590 }
 0x383   :  { %511 = vadd.xlane.f32.xlu0 %v510_v12  ;;  %vm379_vm15 = vmand %vm357_vm12, %vm1803_vm4  ;;  %v446_v55 = vmul.f32 %v1497_v24, %v1939_v1 }
 0x384   :  { %vm395_vm5 = vmor %vm341_vm13, %vm379_vm15  ;;  %v516_v54 = vsel %vm98_vm2, %v442_v33, 0.0 }
 0x385   :  { %v222_v14 = vpop.permute.xlu1 %221  ;;  %v1494_v15 = vsel %vm395_vm5, 1.0, %v1689_v2  ;;  %v540_v60 = vsel %vm98_vm2, %v446_v55, 0.0 }
 0x386   :  { %vm358_vm6 = vcmp.eq.f32.partialorder %v1952_v7, %v222_v14  ;;  %v519_v16 = vsel %vm98_vm2, %v1494_v15, 0.0  ;;  %vm342_vm0 = vcmp.gt.f32.partialorder %v1952_v7, %v222_v14  ;;  %v443_v56 = vmul.f32 %v1494_v15, %v1952_v7  ;;  %v2026_v9 = vpop.permute.xlu0 %601 }
 0x387   :  { %520 = vadd.xlane.f32.xlu1 %v519_v16  ;;  %vm380_vm9 = vmand %vm358_vm6, %vm1816_vm8 }
 0x388   :  { %vm396_vm10 = vmor %vm342_vm0, %vm380_vm9  ;;  %v525_v58 = vsel %vm98_vm2, %v443_v56, 0.0 }
 0x389   :  { %v229_v17 = vpop.permute.xlu1 %228  ;;  %v1495_v19 = vsel %vm396_vm10, 1.0, %v1689_v2 }
 0x38a   :  { %vm343_vm12 = vcmp.gt.f32.partialorder %v1939_v1, %v229_v17  ;;  %vm359_vm13 = vcmp.eq.f32.partialorder %v1939_v1, %v229_v17  ;;  %v522_v20 = vsel %vm98_vm2, %v1495_v19, 0.0  ;;  %v444_v43 = vmul.f32 %v1495_v19, %v1952_v7  ;;  %v2028_v11 = vpop.permute.xlu0 %612 }
 0x38b   :  { %vm381_vm15 = vmand %vm359_vm13, %vm1803_vm4  ;;  %523 = vadd.xlane.f32.xlu0 %v522_v20 }
 0x38c   :  { %vm397_vm11 = vmor %vm343_vm12, %vm381_vm15  ;;  %v528_v57 = vsel %vm98_vm2, %v444_v43, 0.0 }
 0x38d   :  { %v1496_v6 = vsel %vm397_vm11, 1.0, %v1689_v2  ;;  %v565_v4 = vpop.permute.xlu1 %564 }
 0x38e   :  { %v531_v28 = vsel %vm98_vm2, %v1496_v6, 0.0  ;;  %v445_v59 = vmul.f32 %v1496_v6, %v1939_v1  ;;  %v2030_v14 = vpop.permute.xlu0 %623 }
 0x38f   :  { %535 = vadd.xlane.f32.xlu0 %v534_v27  ;;  %532 = vadd.xlane.f32.xlu1 %v531_v28 }
 0x390   :  { %v537_v63 = vsel %vm98_vm2, %v445_v59, 0.0 }
 0x391   :  { %v576_v7 = vpop.permute.xlu1 %575 }
 0x392   :  { %v2034_v16 = vpop.permute.xlu0 %634 }
 0x393   :  { %457 = vadd.xlane.f32.xlu0 %v456_v0  ;;  %454 = vadd.xlane.f32.xlu1 %v453_v34 }
 0x395   :  { %v580_v1 = vpop.permute.xlu1 %579 }
 0x397   :  { %469 = vadd.xlane.f32.xlu0 %v468_v38  ;;  %466 = vadd.xlane.f32.xlu1 %v465_v13 }
 0x399   :  { %v587_v12 = vpop.permute.xlu1 %586 }
 0x39b   :  { %481 = vadd.xlane.f32.xlu0 %v480_v42  ;;  %478 = vadd.xlane.f32.xlu1 %v477_v25 }
 0x39d   :  { %v2032_v15 = vpop.permute.xlu1 %597 }
 0x39f   :  { %493 = vadd.xlane.f32.xlu0 %v492_v46  ;;  %490 = vadd.xlane.f32.xlu1 %v489_v35 }
 0x3a1   :  { %v2036_v17 = vpop.permute.xlu1 %608 }
 0x3a3   :  { %505 = vadd.xlane.f32.xlu0 %v504_v48  ;;  %502 = vadd.xlane.f32.xlu1 %v501_v50 }
 0x3a5   :  { %v2038_v19 = vpop.permute.xlu1 %619 }
 0x3a7   :  { %517 = vadd.xlane.f32.xlu0 %v516_v54  ;;  %514 = vadd.xlane.f32.xlu1 %v513_v22 }
 0x3a9   :  { %v2040_v24 = vpop.permute.xlu1 %630 }
 0x3ab   :  { %529 = vadd.xlane.f32.xlu0 %v528_v57  ;;  %526 = vadd.xlane.f32.xlu1 %v525_v58 }
 0x3af   :  { %541 = vadd.xlane.f32.xlu0 %v540_v60  ;;  %538 = vadd.xlane.f32.xlu1 %v537_v63 }
 0x3c0   :  { %641 = vbcast.lane.b32.xlu1 %v1767_v45, 256 }
 0x3c5   :  { %645 = vbcast.lane.b32.xlu0 %v1767_v45, 264 }
 0x3e4   :  { %v449_v6 = vpop.xlane.xlu1 %448 }
 0x3e5   :  { %1585 = vrcp.f32 %v449_v6  ;;  %v663_v25 = vmul.f32 %v565_v4, %v449_v6 }
 0x3e8   :  { %v452_v45 = vpop.xlane.xlu0 %451 }
 0x3e9   :  { %1587 = vrcp.f32 %v452_v45  ;;  %v664_v35 = vmul.f32 %v569_v3, %v452_v45 }
 0x3ec   :  { %v461_v20 = vpop.xlane.xlu0 %460 }
 0x3ed   :  { %1589 = vrcp.f32 %v461_v20  ;;  %v665_v40 = vmul.f32 %v576_v7, %v461_v20 }
 0x3f0   :  { %v464_v27 = vpop.xlane.xlu0 %463 }
 0x3f1   :  { %1591 = vrcp.f32 %v464_v27  ;;  %v666_v59 = vmul.f32 %v580_v1, %v464_v27 }
 0x3f2   :  { %v1586_v46 = vpop.eup %1585 }
 0x3f4   :  { %v473_v28 = vpop.xlane.xlu1 %472 }
 0x3f5   :  { %1593 = vrcp.f32 %v473_v28  ;;  %v667_v63 = vmul.f32 %v587_v12, %v473_v28 }
 0x3f6   :  { %v1588_v48 = vpop.eup %1587 }
 0x3f8   :  { %v476_v29 = vpop.xlane.xlu0 %475 }
 0x3f9   :  { %1595 = vrcp.f32 %v476_v29 }
 0x3fa   :  { %v1590_v58 = vpop.eup %1589 }
 0x3fc   :  { %v485_v32 = vpop.xlane.xlu1 %484 }
 0x3fd   :  { %1597 = vrcp.f32 %v485_v32  ;;  %v669_v12 = vmul.f32 %v2032_v15, %v485_v32 }
 0x3fe   :  { %v1592_v55 = vpop.eup %1591 }
 0x400   :  { %v2042_v0 = vpop.xlane.xlu0 %487  ;;  %v2044_v34 = vpop.xlane.xlu1 %496 }
 0x401   :  { %1599 = vrcp.f32 %v2042_v0  ;;  %v671_v32 = vmul.f32 %v2036_v17, %v2044_v34 }
 0x402   :  { %1601 = vrcp.f32 %v2044_v34 }
 0x404   :  { %v2046_v36 = vpop.xlane.xlu0 %499 }
 0x405   :  { %1603 = vrcp.f32 %v2046_v36 }
 0x408   :  { %v2048_v37 = vpop.xlane.xlu1 %508 }
 0x409   :  { %1605 = vrcp.f32 %v2048_v37  ;;  %v673_v34 = vmul.f32 %v2038_v19, %v2048_v37 }
 0x40c   :  { %v2050_v38 = vpop.xlane.xlu0 %511 }
 0x40d   :  { %1607 = vrcp.f32 %v2050_v38  ;;  %v674_v19 = vmul.f32 %v2030_v14, %v2050_v38 }
 0x410   :  { %v2052_v13 = vpop.xlane.xlu1 %520 }
 0x411   :  { %1609 = vrcp.f32 %v2052_v13  ;;  %v675_v37 = vmul.f32 %v2040_v24, %v2052_v13 }
 0x414   :  { %v2054_v62 = vpop.xlane.xlu0 %523 }
 0x415   :  { %1611 = vrcp.f32 %v2054_v62  ;;  %v676_v14 = vmul.f32 %v2034_v16, %v2054_v62 }
 0x418   :  { %v2056_v8 = vpop.xlane.xlu0 %535  ;;  %v2058_v42 = vpop.xlane.xlu1 %532 }
 0x419   :  { %1613 = vrcp.f32 %v2056_v8 }
 0x41a   :  { %1615 = vrcp.f32 %v2058_v42 }
 0x41c   :  { %v458_v10 = vpop.xlane.xlu0 %457  ;;  %v455_v18 = vpop.xlane.xlu1 %454 }
 0x41d   :  { %v1499_v21 = vadd.f32 -1.0, %v458_v10  ;;  %v1498_v30 = vadd.f32 -1.0, %v455_v18  ;;  %v668_v18 = vmul.f32 %v2024_v5, %v476_v29  ;;  %v670_v29 = vmul.f32 %v2026_v9, %v2042_v0 }
 0x41e   :  { %v672_v0 = vmul.f32 %v2028_v11, %v2046_v36 }
 0x41f   :  { %vm680_vm4 = vcmp.gt.f32.partialorder %v664_v35, %v1499_v21  ;;  %v698_v50 = vmul.f32 %v1588_v48, %v1499_v21  ;;  %vm679_vm8 = vcmp.gt.f32.partialorder %v663_v25, %v1498_v30  ;;  %v696_v33 = vmul.f32 %v1586_v46, %v1498_v30  ;;  %v1594_v25 = vpop.eup %1593 }
 0x420   :  { %v470_v52 = vpop.xlane.xlu0 %469  ;;  %v467_v54 = vpop.xlane.xlu1 %466 }
 0x421   :  { %v1501_v22 = vadd.f32 -1.0, %v470_v52  ;;  %v1500_v43 = vadd.f32 -1.0, %v467_v54  ;;  %v728_v56 = vsel %vm680_vm4, %v698_v50, -inf  ;;  %v727_v57 = vsel %vm679_vm8, %v696_v33, -inf  ;;  %v1596_v10 = vpop.eup %1595 }
 0x422   :  { %763 = vperm.xlu0 %1582, %v728_v56   ;;  %760 = vperm.xlu1 %1581, %v727_v57   ;;  %v1598_v50 = vpop.eup %1597 }
 0x423   :  { %vm681_vm14 = vcmp.gt.f32.partialorder %v665_v40, %v1500_v43  ;;  %v700_v60 = vmul.f32 %v1590_v58, %v1500_v43  ;;  %v702_v3 = vmul.f32 %v1592_v55, %v1501_v22  ;;  %vm682_vm5 = vcmp.gt.f32.partialorder %v666_v59, %v1501_v22  ;;  %v1600_v5 = vpop.eup %1599 }
 0x424   :  { %v482_v4 = vpop.xlane.xlu0 %481  ;;  %v479_v7 = vpop.xlane.xlu1 %478 }
 0x425   :  { %v1503_v45 = vadd.f32 -1.0, %v482_v4  ;;  %v1502_v20 = vadd.f32 -1.0, %v479_v7  ;;  %v729_v6 = vsel %vm681_vm14, %v700_v60, -inf  ;;  %v730_v35 = vsel %vm682_vm5, %v702_v3, -inf  ;;  %v1602_v22 = vpop.eup %1601 }
 0x426   :  { %766 = vperm.xlu1 %1581, %v729_v6   ;;  %v1604_v9 = vpop.eup %1603  ;;  %vm816_vm5 = vcmask 130112  }
 0x427   :  { %vm683_vm6 = vcmp.gt.f32.partialorder %v667_v63, %v1502_v20  ;;  %v704_v1 = vmul.f32 %v1594_v25, %v1502_v20  ;;  %v706_v27 = vmul.f32 %v1596_v10, %v1503_v45  ;;  %vm684_vm0 = vcmp.gt.f32.partialorder %v668_v18, %v1503_v45  ;;  %v1606_v63 = vpop.eup %1605 }
 0x428   :  { %v494_v28 = vpop.xlane.xlu0 %493  ;;  %v491_v46 = vpop.xlane.xlu1 %490 }
 0x429   :  { %v1505_v21 = vadd.f32 -1.0, %v494_v28  ;;  %v1504_v30 = vadd.f32 -1.0, %v491_v46  ;;  %v731_v48 = vsel %vm683_vm6, %v704_v1, -inf  ;;  %v732_v54 = vsel %vm684_vm0, %v706_v27, -inf  ;;  %v1608_v36 = vpop.eup %1607 }
 0x42a   :  { %769 = vperm.xlu1 %1581, %v730_v35   ;;  %772 = vperm.xlu0 %1582, %v731_v48   ;;  %v1610_v25 = vpop.eup %1609  ;;  %vm881_vm6 = vcmask 1041409   ;;  %vm883_vm0 = vcmask 1042434  }
 0x42b   :  { %vm685_vm7 = vcmp.gt.f32.partialorder %v669_v12, %v1504_v30  ;;  %v708_v15 = vmul.f32 %v1598_v50, %v1504_v30  ;;  %v710_v33 = vmul.f32 %v1600_v5, %v1505_v21  ;;  %vm686_vm9 = vcmp.gt.f32.partialorder %v670_v29, %v1505_v21  ;;  %v1612_v28 = vpop.eup %1611 }
 0x42c   :  { %v506_v40 = vpop.xlane.xlu0 %505  ;;  %v503_v52 = vpop.xlane.xlu1 %502 }
 0x42d   :  { %v1507_v43 = vadd.f32 -1.0, %v506_v40  ;;  %v1506_v56 = vadd.f32 -1.0, %v503_v52  ;;  %v733_v57 = vsel %vm685_vm7, %v708_v15, -inf  ;;  %v734_v60 = vsel %vm686_vm9, %v710_v33, -inf  ;;  %v1614_v48 = vpop.eup %1613 }
 0x42e   :  { %775 = vperm.xlu1 %1581, %v732_v54   ;;  %778 = vperm.xlu0 %1582, %v733_v57   ;;  %v1616_v29 = vpop.eup %1615  ;;  %vm885_vm7 = vcmask 1043459   ;;  %vm887_vm9 = vcmask 1044484  }
 0x42f   :  { %vm687_vm10 = vcmp.gt.f32.partialorder %v671_v32, %v1506_v56  ;;  %v712_v17 = vmul.f32 %v1602_v22, %v1506_v56  ;;  %v714_v58 = vmul.f32 %v1604_v9, %v1507_v43  ;;  %vm688_vm12 = vcmp.gt.f32.partialorder %v672_v0, %v1507_v43 }
 0x430   :  { %v518_v55 = vpop.xlane.xlu0 %517  ;;  %v515_v59 = vpop.xlane.xlu1 %514 }
 0x431   :  { %v1509_v3 = vadd.f32 -1.0, %v518_v55  ;;  %v1508_v4 = vadd.f32 -1.0, %v515_v59  ;;  %v735_v7 = vsel %vm687_vm10, %v712_v17, -inf  ;;  %v736_v6 = vsel %vm688_vm12, %v714_v58, -inf }
 0x432   :  { %781 = vperm.xlu1 %1581, %v734_v60   ;;  %784 = vperm.xlu0 %1582, %v735_v7   ;;  %v809_v55 = vsub.s32 %v1796_v61, %v1741_v23  ;;  %vm889_vm10 = vcmask 1045509   ;;  %vm891_vm12 = vcmask 1046534  }
 0x433   :  { %vm689_vm13 = vcmp.gt.f32.partialorder %v673_v34, %v1508_v4  ;;  %v716_v11 = vmul.f32 %v1606_v63, %v1508_v4  ;;  %v718_v10 = vmul.f32 %v1608_v36, %v1509_v3  ;;  %vm690_vm15 = vcmp.gt.f32.partialorder %v674_v19, %v1509_v3 }
 0x434   :  { %v530_v45 = vpop.xlane.xlu0 %529  ;;  %v527_v20 = vpop.xlane.xlu1 %526 }
 0x435   :  { %v1511_v18 = vadd.f32 -1.0, %v530_v45  ;;  %v1510_v1 = vadd.f32 -1.0, %v527_v20  ;;  %v737_v12 = vsel %vm689_vm13, %v716_v11, -inf  ;;  %v738_v13 = vsel %vm690_vm15, %v718_v10, -inf }
 0x436   :  { %787 = vperm.xlu1 %1581, %v736_v6   ;;  %790 = vperm.xlu0 %1582, %v737_v12   ;;  %vm893_vm13 = vcmask 1047559   ;;  %vm1007_vm15 = vcmask 523264  }
 0x437   :  { %vm691_vm11 = vcmp.gt.f32.partialorder %v675_v37, %v1510_v1  ;;  %v720_v27 = vmul.f32 %v1610_v25, %v1510_v1  ;;  %v722_v24 = vmul.f32 %v1612_v28, %v1511_v18  ;;  %vm692_vm4 = vcmp.gt.f32.partialorder %v676_v14, %v1511_v18 }
 0x438   :  { %v542_v38 = vpop.xlane.xlu0 %541  ;;  %v539_v46 = vpop.xlane.xlu1 %538 }
 0x439   :  { %v739_v35 = vsel %vm691_vm11, %v720_v27, -inf  ;;  %v1513_v21 = vadd.f32 -1.0, %v542_v38  ;;  %v1512_v30 = vadd.f32 -1.0, %v539_v46  ;;  %v740_v33 = vsel %vm692_vm4, %v722_v24, -inf }
 0x43a   :  { %793 = vperm.xlu1 %1581, %v738_v13   ;;  %796 = vperm.xlu0 %1582, %v739_v35  }
 0x43b   :  { %v726_v16 = vmul.f32 %v1614_v48, %v1513_v21  ;;  %v724_v62 = vmul.f32 %v1616_v29, %v1512_v30 }
 0x43c   :  { %v646_v50 = vpop.permute.xlu0 %645  ;;  %v642_v5 = vpop.permute.xlu1 %641 }
 0x43d   :  { %v678_v15 = vmul.f32 %v646_v50, %v2056_v8  ;;  %v677_v32 = vmul.f32 %v642_v5, %v2058_v42  ;;  %v811_v42 = vadd.s32 4294967288, %v1796_v61 }
 0x43e   :  { %799 = vperm.xlu1 %1581, %v740_v33  }
 0x43f   :  { %vm694_vm8 = vcmp.gt.f32.partialorder %v678_v15, %v1513_v21  ;;  %vm693_vm14 = vcmp.gt.f32.partialorder %v677_v32, %v1512_v30  ;;  %v814_v58 = vsub.s32 %v811_v42, %v1741_v23 }
 0x440   :  { %v741_v40 = vsel %vm693_vm14, %v724_v62, -inf  ;;  %v742_v52 = vsel %vm694_vm8, %v726_v16, -inf }
 0x441   :  { %802 = vperm.xlu0 %1582, %v741_v40   ;;  %v925_v40 = vld [vmem:[%s2217_s1 + $0x10] sm:$0xff] }
 0x442   :  { %805 = vperm.xlu1 %1581, %v742_v52   ;;  %v924_v52 = vld [vmem:[%s2217_s1 + $0x8] sm:$0xff]  ;;  %1542 = vmatpush3.msra.mxu1 %v925_v40 }
 0x443   :  { %1543 = vmatprep.subr.mxu1 %v1689_v2 }
 0x444   :  { %1544 = vmatpush3.msra.mxu1 %v924_v52 }
 0x445   :  { %1555 = vmatprep.subr.mxu1 %v1689_v2 }
 0x49d   :  { %v761_v54 = vpop.permute.xlu1 %760  ;;  %v764_v22 = vpop.permute.xlu0 %763 }
 0x49e   :  { %v815_v4 = vrot.slane %v764_v22, %v814_v58  ;;  %v810_v7 = vrot.slane %v761_v54, %v809_v55 }
 0x4a0   :  { %v817_v1 = vsel %vm816_vm5, %v815_v4, %v810_v7 }
 0x4a1   :  { %v767_v43 = vpop.permute.xlu1 %766 }
 0x4a2   :  { %v821_v11 = vrot.slane %v767_v43, %v809_v55 }
 0x4a5   :  { %v773_v56 = vpop.permute.xlu0 %772  ;;  %v770_v57 = vpop.permute.xlu1 %769 }
 0x4a6   :  { %v825_v60 = vrot.slane %v770_v57, %v814_v58  ;;  %v830_v19 = vrot.slane %v773_v56, %v809_v55  ;;  %v1643_v57 = vld [vmem:[%s2216_s0] sm:$0xff] }
 0x4a8   :  { %v826_v45 = vsel %vm816_vm5, %v825_v60, %v821_v11 }
 0x4a9   :  { %v779_v9 = vpop.permute.xlu0 %778  ;;  %v776_v0 = vpop.permute.xlu1 %775  ;;  %v882_v14 = vsel %vm881_vm6, %v826_v45, %v817_v1 }
 0x4aa   :  { %v834_v63 = vrot.slane %v776_v0, %v814_v58  ;;  %v839_v20 = vrot.slane %v779_v9, %v809_v55 }
 0x4ac   :  { %v835_v61 = vsel %vm816_vm5, %v834_v63, %v830_v19 }
 0x4ad   :  { %v785_v8 = vpop.permute.xlu0 %784  ;;  %v782_v17 = vpop.permute.xlu1 %781  ;;  %v884_v24 = vsel %vm883_vm0, %v835_v61, %v882_v14 }
 0x4ae   :  { %v843_v36 = vrot.slane %v782_v17, %v814_v58  ;;  %v848_v10 = vrot.slane %v785_v8, %v809_v55 }
 0x4b0   :  { %v844_v12 = vsel %vm816_vm5, %v843_v36, %v839_v20 }
 0x4b1   :  { %v788_v34 = vpop.permute.xlu1 %787  ;;  %v791_v59 = vpop.permute.xlu0 %790  ;;  %v886_v21 = vsel %vm885_vm7, %v844_v12, %v884_v24 }
 0x4b2   :  { %v852_v37 = vrot.slane %v788_v34, %v814_v58  ;;  %v857_v27 = vrot.slane %v791_v59, %v809_v55 }
 0x4b4   :  { %v853_v38 = vsel %vm816_vm5, %v852_v37, %v848_v10  ;;  %v2135_v10 = vld [vmem:[%s2217_s1 + $0x48] sm:$0xff] }
 0x4b5   :  { %v794_v3 = vpop.permute.xlu1 %793  ;;  %v797_v6 = vpop.permute.xlu0 %796  ;;  %v888_v5 = vsel %vm887_vm9, %v853_v38, %v886_v21  ;;  %v1057_v21 = vld [vmem:[%s2217_s1 + $0x18] sm:$0xff] }
 0x4b6   :  { %v861_v25 = vrot.slane %v794_v3, %v814_v58  ;;  %v866_v46 = vrot.slane %v797_v6, %v809_v55 }
 0x4b8   :  { %v862_v13 = vsel %vm816_vm5, %v861_v25, %v857_v27  ;;  %v1058_v25 = vld [vmem:[%s2217_s1 + $0x20] sm:$0xff] }
 0x4b9   :  { %v800_v18 = vpop.permute.xlu1 %799  ;;  %v890_v15 = vsel %vm889_vm10, %v862_v13, %v888_v5  ;;  %1549 = vmatpush3.msra.mxu0 %v1058_v25 }
 0x4ba   :  { %v870_v28 = vrot.slane %v800_v18, %v814_v58  ;;  %1550 = vmatprep.subr.mxu0 %v1689_v2 }
 0x4bb   :  { %1551 = vmatpush3.msra.mxu0 %v1057_v21 }
 0x4bc   :  { %v803_v35 = vpop.permute.xlu0 %802  ;;  %v871_v30 = vsel %vm816_vm5, %v870_v28, %v866_v46  ;;  %1562 = vmatprep.subr.mxu0 %v1689_v2 }
 0x4bd   :  { %v875_v48 = vrot.slane %v803_v35, %v809_v55  ;;  %v806_v50 = vpop.permute.xlu1 %805  ;;  %v892_v33 = vsel %vm891_vm12, %v871_v30, %v890_v15 }
 0x4be   :  { %v879_v29 = vrot.slane %v806_v50, %v814_v58 }
 0x4c0   :  { %v880_v32 = vsel %vm816_vm5, %v879_v29, %v875_v48 }
 0x4c1   :  { %v894_v16 = vsel %vm893_vm13, %v880_v32, %v892_v33 }
 0x4c2   :  { %v896_v62 = vsel %vm98_vm2, %v894_v16, -inf }
 0x4c3   :  { %897 = vmax.xlane.f32.xlu0 %v896_v62 }
 0x54c   :  { %v898_v54 = vpop.xlane.xlu0 %897 }
 0x54d   :  { %v899_v22 = vsub.f32 %v1756_v41, %v898_v54 }
 0x54f   :  { %v2112_v43 = vmax.f32 %v899_v22, 0.0 }
 0x551   :  { %920 = vrot.lane.b32.xlu1 %v2112_v43, %s1691_s16 }
 0x5c3   :  { %v921_v56 = vpop.permute.xlu1 %920 }
 0x5c4   :  { %v923_v9 = vmul.f32 %v1643_v57, %v921_v56 }
 0x5c6   :  { %927 = vrot.lane.b32.xlu1 %v923_v9, %s1692_s17 }
 0x638   :  { %v928_v0 = vpop.permute.xlu1 %927 }
 0x639   :  { %1546 = vmatmul.mubr.msk.f32.vlgmr.msra.gmra.mxu1 %vm98_vm2, %v928_v0 }
 0x63a   :  { %1559 = vmatprep.mubr.msk.f32.mxu1 %vm1690_vm1, %v1689_v2 }
 0x6f9   :  { %v997_v41 = vpop.f32.mrf.mxu1 }
 0x6fa   :  { %v1001_v8 = vmul.f32 %v997_v41, %v997_v41 }
 0x6fb   :  { %v1547_v17 = vpop.f32.mrf.mxu1 }
 0x6fc   :  { %1003 = vrot.lane.b32.xlu1 %v1001_v8, %s1696_s27 }
 0x76e   :  { %v1004_v42 = vpop.permute.xlu1 %1003 }
 0x76f   :  { %v1006_v34 = vsel %vm100_vm3, %v997_v41, %v1004_v42 }
 0x770   :  { %v1008_v58 = vsel %vm1007_vm15, %v1006_v34, 0.0 }
 0x771   :  { %v1009_v55 = vrot.slane %v1008_v58, 4 }
 0x773   :  { %v1010_v59 = vadd.f32 %v1009_v55, %v1008_v58 }
 0x775   :  { %v1011_v60 = vrot.slane %v1010_v59, 2 }
 0x777   :  { %v1012_v63 = vadd.f32 %v1011_v60, %v1010_v59 }
 0x779   :  { %v1013_v3 = vrot.slane %v1012_v63, 1 }
 0x77b   :  { %v1014_v4 = vadd.f32 %v1013_v3, %v1012_v63 }
 0x77d   :  { %v1015_v7 = vmul.f32 0.125, %v1014_v4 }
 0x77f   :  { %v1016_v11 = vmul.f32 %v1015_v7, %v1015_v7 }
 0x781   :  { %1018 = vrot.lane.b32.xlu1 %v1016_v11, %s1696_s27 }
 0x7f3   :  { %v1019_v36 = vpop.permute.xlu1 %1018 }
 0x7f4   :  { %v1021_v19 = vsub.f32 %v1015_v7, %v1019_v36 }
 0x7f6   :  { %v1022_v37 = vmax.f32 %v1021_v19, 0.0  ;;  %v1190_v19 = vld [vmem:[%s2217_s1 + $0x30] sm:$0xff] }
 0x7f7   :  { %1556 = vmatpush3.msra.mxu1 %v1190_v19 }
 0x7f8   :  { %v1023_v45 = vadd.f32 1e-05, %v1022_v37  ;;  %1557 = vmatprep.subr.mxu1 %v1689_v2 }
 0x7fa   :  { %1617 = vrsqrt.f32 %v1023_v45 }
 0x807   :  { %v1618_v20 = vpop.eup %1617 }
 0x808   :  { %v1026_v6 = vrot.slane %v1618_v20, 6 }
 0x80a   :  { %1027 = vrot.lane.b32.xlu1 %v1026_v6, %s1693_s18 }
 0x87c   :  { %v1028_v61 = vpop.permute.xlu1 %1027 }
 0x87d   :  { %v1030_v18 = vmul.f32 %v2135_v10, %v1028_v61 }
 0x87f   :  { %v1036_v1 = vmul.f32 %v1030_v18, %v1015_v7  ;;  %v1034_v12 = vrot.slane %v1030_v18, %v170_v47 }
 0x881   :  { %v1038_v27 = vrot.slane %v1036_v1, 7  ;;  %v1035_v14 = vmul.f32 %v1034_v12, %v997_v41 }
 0x883   :  { %v1040_v28 = vsub.f32 %v2135_v10, %v1038_v27 }
 0x885   :  { %v1044_v38 = vrot.slane %v1040_v28, %v181_v49 }
 0x887   :  { %v1045_v46 = vadd.f32 %v1044_v38, %v1035_v14 }
 0x889   :  { %v1515_v24 = vmul.f32 -1.442695, %v1045_v46 }
 0x88b   :  { %1619 = vpow2.f32 %v1515_v24 }
 0x898   :  { %v1620_v13 = vpop.eup %1619 }
 0x899   :  { %v1049_v35 = vadd.f32 1.0, %v1620_v13 }
 0x89b   :  { %1621 = vrcp.f32 %v1049_v35 }
 0x8a8   :  { %v1622_v47 = vpop.eup %1621 }
 0x8a9   :  { %1053 = vrot.lane.b32.xlu1 %v1622_v47, %s1692_s17 }
 0x91b   :  { %v1054_v30 = vpop.permute.xlu1 %1053 }
 0x91c   :  { %v1056_v48 = vmul.f32 %v1054_v30, %v1045_v46 }
 0x91e   :  { %1553 = vmatmul.mubr.msk.f32.vlgmr.msra.gmra.mxu0 %vm98_vm2, %v1056_v48 }
 0x91f   :  { %1566 = vmatprep.mubr.msk.f32.mxu0 %vm1690_vm1, %v1689_v2 }
 0x9de   :  { %v1128_v49 = vpop.f32.mrf.mxu0 }
 0x9df   :  { %v1132_v50 = vmul.f32 %v1128_v49, %v1128_v49 }
 0x9e0   :  { %v1554_v5 = vpop.f32.mrf.mxu0 }
 0x9e1   :  { %1134 = vrot.lane.b32.xlu1 %v1132_v50, %s1696_s27 }
 0xa53   :  { %v1135_v29 = vpop.permute.xlu1 %1134 }
 0xa54   :  { %v1137_v15 = vsel %vm100_vm3, %v1128_v49, %v1135_v29 }
 0xa55   :  { %v1138_v32 = vsel %vm1007_vm15, %v1137_v15, 0.0 }
 0xa56   :  { %v1139_v33 = vrot.slane %v1138_v32, 4 }
 0xa58   :  { %v1140_v16 = vadd.f32 %v1139_v33, %v1138_v32 }
 0xa5a   :  { %v1141_v62 = vrot.slane %v1140_v16, 2 }
 0xa5c   :  { %v1142_v40 = vadd.f32 %v1141_v62, %v1140_v16 }
 0xa5e   :  { %v1143_v52 = vrot.slane %v1142_v40, 1 }
 0xa60   :  { %v1144_v54 = vadd.f32 %v1143_v52, %v1142_v40 }
 0xa62   :  { %v1145_v22 = vmul.f32 0.125, %v1144_v54 }
 0xa64   :  { %v1146_v56 = vmul.f32 %v1145_v22, %v1145_v22 }
 0xa66   :  { %1148 = vrot.lane.b32.xlu0 %v1146_v56, %s1696_s27 }
 0xad8   :  { %v1149_v57 = vpop.permute.xlu0 %1148 }
 0xad9   :  { %v1151_v9 = vsub.f32 %v1145_v22, %v1149_v57 }
 0xadb   :  { %v1152_v0 = vmax.f32 %v1151_v9, 0.0  ;;  %v1322_v9 = vld [vmem:[%s2217_s1 + $0x40] sm:$0xff] }
 0xadc   :  { %1563 = vmatpush3.msra.mxu0 %v1322_v9 }
 0xadd   :  { %v1153_v41 = vadd.f32 1e-05, %v1152_v0  ;;  %1564 = vmatprep.subr.mxu0 %v1689_v2 }
 0xadf   :  { %1623 = vrsqrt.f32 %v1153_v41 }
 0xaec   :  { %v1624_v8 = vpop.eup %1623 }
 0xaed   :  { %v1156_v17 = vrot.slane %v1624_v8, 4 }
 0xaef   :  { %1157 = vrot.lane.b32.xlu1 %v1156_v17, %s1693_s18 }
 0xb61   :  { %v1158_v42 = vpop.permute.xlu1 %1157 }
 0xb62   :  { %v1160_v34 = vmul.f32 %v2135_v10, %v1158_v42 }
 0xb64   :  { %v1166_v58 = vmul.f32 %v1160_v34, %v1145_v22  ;;  %v1164_v55 = vrot.slane %v1160_v34, %v192_v39  ;;  %v1189_v39 = vld [vmem:[%s2217_s1 + $0x28] sm:$0xff] }
 0xb65   :  { %1558 = vmatpush3.msra.mxu1 %v1189_v39 }
 0xb66   :  { %v1168_v59 = vrot.slane %v1166_v58, 7  ;;  %v1165_v63 = vmul.f32 %v1164_v55, %v1128_v49 }
 0xb68   :  { %v1170_v60 = vsub.f32 %v2135_v10, %v1168_v59 }
 0xb6a   :  { %v1174_v3 = vrot.slane %v1170_v60, %v203_v51 }
 0xb6c   :  { %v1175_v4 = vadd.f32 %v1174_v3, %v1165_v63 }
 0xb6e   :  { %v1517_v7 = vmul.f32 -1.442695, %v1175_v4 }
 0xb70   :  { %1625 = vpow2.f32 %v1517_v7 }
 0xb7d   :  { %v1626_v11 = vpop.eup %1625 }
 0xb7e   :  { %v1179_v36 = vadd.f32 1.0, %v1626_v11 }
 0xb80   :  { %1627 = vrcp.f32 %v1179_v36  ;;  %v902_v36 = vadd.f32 1e-10, %v2112_v43 }
 0xb8d   :  { %v1628_v37 = vpop.eup %1627 }
 0xb8e   :  { %1183 = vrot.lane.b32.xlu1 %v1628_v37, %s1692_s17  ;;  %v901_v37 = vsub.f32 0.0, %v2112_v43 }
 0xc00   :  { %v1184_v51 = vpop.permute.xlu1 %1183 }
 0xc01   :  { %v1186_v45 = vmul.f32 %v1184_v51, %v1175_v4 }
 0xc03   :  { %v1187_v20 = vadd.f32 %v1186_v45, %v1056_v48 }
 0xc05   :  { %v1188_v6 = vmul.f32 0.70710677, %v1187_v20 }
 0xc07   :  { %1560 = vmatmul.mubr.msk.f32.vlgmr.msra.gmra.mxu1 %vm98_vm2, %v1188_v6 }
 0xcc7   :  { %v1260_v25 = vpop.f32.mrf.mxu1 }
 0xcc8   :  { %v1264_v61 = vmul.f32 %v1260_v25, %v1260_v25 }
 0xcc9   :  { %v1561_v18 = vpop.f32.mrf.mxu1 }
 0xcca   :  { %1266 = vrot.lane.b32.xlu1 %v1264_v61, %s1696_s27 }
 0xd3c   :  { %v1267_v1 = vpop.permute.xlu1 %1266 }
 0xd3d   :  { %v1269_v12 = vsel %vm100_vm3, %v1260_v25, %v1267_v1 }
 0xd3e   :  { %v1270_v27 = vsel %vm1007_vm15, %v1269_v12, 0.0 }
 0xd3f   :  { %v1271_v28 = vrot.slane %v1270_v27, 4 }
 0xd41   :  { %v1272_v14 = vadd.f32 %v1271_v28, %v1270_v27 }
 0xd43   :  { %v1273_v38 = vrot.slane %v1272_v14, 2 }
 0xd45   :  { %v1274_v46 = vadd.f32 %v1273_v38, %v1272_v14 }
 0xd47   :  { %v1275_v24 = vrot.slane %v1274_v46, 1 }
 0xd49   :  { %v1276_v13 = vadd.f32 %v1275_v24, %v1274_v46  ;;  %v17_v24 = vld [vmem:[%s2217_s1 + $0x50] sm:$0xff] }
 0xd4b   :  { %v1277_v35 = vmul.f32 0.125, %v1276_v13 }
 0xd4d   :  { %v1278_v21 = vmul.f32 %v1277_v35, %v1277_v35 }
 0xd4f   :  { %1280 = vrot.lane.b32.xlu1 %v1278_v21, %s1696_s27 }
 0xdc1   :  { %v1281_v47 = vpop.permute.xlu1 %1280 }
 0xdc2   :  { %v1283_v30 = vsub.f32 %v1277_v35, %v1281_v47 }
 0xdc4   :  { %v1284_v48 = vmax.f32 %v1283_v30, 0.0 }
 0xdc6   :  { %v1285_v49 = vadd.f32 1e-05, %v1284_v48 }
 0xdc8   :  { %1629 = vrsqrt.f32 %v1285_v49 }
 0xdd5   :  { %v1630_v50 = vpop.eup %1629 }
 0xdd6   :  { %v1288_v5 = vrot.slane %v1630_v50, 2 }
 0xdd8   :  { %1289 = vrot.lane.b32.xlu1 %v1288_v5, %s1693_s18 }
 0xe4a   :  { %v1290_v29 = vpop.permute.xlu1 %1289 }
 0xe4b   :  { %v1292_v15 = vmul.f32 %v2135_v10, %v1290_v29 }
 0xe4d   :  { %v1298_v32 = vmul.f32 %v1292_v15, %v1277_v35  ;;  %v1296_v33 = vrot.slane %v1292_v15, %v214_v53  ;;  %v1321_v53 = vld [vmem:[%s2217_s1 + $0x38] sm:$0xff] }
 0xe4e   :  { %1565 = vmatpush3.msra.mxu0 %v1321_v53 }
 0xe4f   :  { %v1300_v16 = vrot.slane %v1298_v32, 7  ;;  %v1297_v40 = vmul.f32 %v1296_v33, %v1260_v25 }
 0xe51   :  { %v1302_v62 = vsub.f32 %v2135_v10, %v1300_v16 }
 0xe53   :  { %v1306_v52 = vrot.slane %v1302_v62, %v225_v44 }
 0xe55   :  { %v1307_v54 = vadd.f32 %v1306_v52, %v1297_v40 }
 0xe57   :  { %v1519_v22 = vmul.f32 -1.442695, %v1307_v54 }
 0xe59   :  { %1631 = vpow2.f32 %v1519_v22 }
 0xe66   :  { %v1632_v56 = vpop.eup %1631 }
 0xe67   :  { %v1311_v57 = vadd.f32 1.0, %v1632_v56 }
 0xe69   :  { %1633 = vrcp.f32 %v1311_v57 }
 0xe6a   :  { %1635 = vlog2.f32 %v902_v36 }
 0xe76   :  { %v1634_v23 = vpop.eup %1633 }
 0xe77   :  { %1315 = vrot.lane.b32.xlu1 %v1634_v23, %s1692_s17  ;;  %v1636_v19 = vpop.eup %1635 }
 0xe78   :  { %v904_v39 = vmul.f32 0.6931472, %v1636_v19 }
 0xe7a   :  { %v905_v51 = vmul.f32 %v904_v39, %v901_v37 }
 0xe7c   :  { %v906_v45 = vsel %vm98_vm2, %v905_v51, 0.0 }
 0xee9   :  { %v1316_v44 = vpop.permute.xlu1 %1315 }
 0xeea   :  { %v1318_v10 = vmul.f32 %v1316_v44, %v1307_v54 }
 0xeec   :  { %v1319_v0 = vadd.f32 %v1318_v10, %v1188_v6 }
 0xeee   :  { %v2190_v41 = vmul.f32 0.70710677, %v1319_v0 }
 0xef0   :  { %1567 = vmatmul.mubr.msk.f32.vlgmr.msra.gmra.mxu0 %vm98_vm2, %v2190_v41 }
 0xfb0   :  { %v1392_v8 = vpop.f32.mrf.mxu0 }
 0xfb1   :  { %v1396_v17 = vmul.f32 %v1392_v8, %v1392_v8 }
 0xfb2   :  { %v1568_v42 = vpop.f32.mrf.mxu0 }
 0xfb3   :  { %1398 = vrot.lane.b32.xlu0 %v1396_v17, %s1696_s27 }
0x1025   :  { %v1399_v34 = vpop.permute.xlu0 %1398 }
0x1026   :  { %v1401_v2 = vsel %vm100_vm3, %v1392_v8, %v1399_v34 }
0x1027   :  { %v1402_v58 = vsel %vm1007_vm15, %v1401_v2, 0.0 }
0x1028   :  { %v1403_v55 = vrot.slane %v1402_v58, 4 }
0x102a   :  { %v1404_v59 = vadd.f32 %v1403_v55, %v1402_v58 }
0x102c   :  { %v1405_v60 = vrot.slane %v1404_v59, 2 }
0x102e   :  { %v1406_v63 = vadd.f32 %v1405_v60, %v1404_v59 }
0x1030   :  { %v1407_v3 = vrot.slane %v1406_v63, 1 }
0x1032   :  { %v1408_v4 = vadd.f32 %v1407_v3, %v1406_v63 }
0x1034   :  { %v1409_v7 = vmul.f32 0.125, %v1408_v4 }
0x1036   :  { %v1410_v11 = vmul.f32 %v1409_v7, %v1409_v7 }
0x1038   :  { %1412 = vrot.lane.b32.xlu1 %v1410_v11, %s1696_s27 }
0x105c   :  { %907 = vadd.xlane.f32.xlu1 %v906_v45 }
0x10aa   :  { %v1413_v20 = vpop.permute.xlu1 %1412 }
0x10ab   :  { %v1415_v6 = vsub.f32 %v1409_v7, %v1413_v20 }
0x10ad   :  { %v1416_v25 = vmax.f32 %v1415_v6, 0.0 }
0x10af   :  { %v1417_v61 = vadd.f32 1e-05, %v1416_v25 }
0x10b1   :  { %1637 = vrsqrt.f32 %v1417_v61 }
0x10be   :  { %v1638_v18 = vpop.eup %1637 }
0x10bf   :  { %1420 = vrot.lane.b32.xlu0 %v1638_v18, %s1693_s18  ;;  %s1697_s18 = smov [#allocation4]  }
0x10c0   :  { %s1469_s19 = sshll.u32 %s1697_s18, 4  ;;  %s1470_s19 = int_to_ptr.vmem [resolvable:$true] %s1469_s19 }
0x10c1   :  { %s1645_s1 = scalar_lea.vmem %s1470_s19, 16  ;;  %s1649_s20 = scalar_lea.vmem %s1470_s19, 32 }
0x10c2   :  { %p1646_p0 = scmp.ne.s32.totalorder %s1470_s19, %s1645_s1  ;;  %p1650_p1 = scmp.lt.s32.totalorder %s1470_s19, %s1470_s19 }
0x10c3   :  { %p1651_p2 = scmp.lt.s32.totalorder %s1649_s20, %s1645_s1 }
0x10c5   :  { %p1652_p3 = por %p1651_p2, %p1650_p1 }
0x10c7   :  { %p1653_p4 = pnand %p1652_p3, %p1646_p0 }
0x10e5   :  { %v908_v1 = vpop.xlane.xlu1 %907 }
0x10e6   :  { %v909_v12 = vrot.slane %v908_v1, 4 }
0x10e8   :  { %v910_v27 = vadd.f32 %v909_v12, %v908_v1 }
0x10ea   :  { %v911_v28 = vrot.slane %v910_v27, 2 }
0x10ec   :  { %v912_v14 = vadd.f32 %v911_v28, %v910_v27 }
0x10ee   :  { %v913_v38 = vrot.slane %v912_v14, 1 }
0x10f0   :  { %v914_v46 = vadd.f32 %v913_v38, %v912_v14 }
0x10f2   :  { %1569 = vpush %v914_v46 }
0x1123   :  { %s1570_s14 = spop %1569 }
0x1124   :  { %v916_v43 = vstv %s1570_s14 }
0x1125   :  { %918 = vst [vmem:[#allocation4] sm:$0x1] %v916_v43 }
0x1131   :  { %v1421_v13 = vpop.permute.xlu0 %1420 }
0x1132   :  { %v1423_v35 = vmul.f32 %v1421_v13, %v17_v24 }
0x1134   :  { %v1429_v21 = vmul.f32 %v1423_v35, %v1409_v7  ;;  %v1427_v47 = vrot.slane %v1423_v35, %v1747_v26 }
0x1136   :  { %v1431_v30 = vrot.slane %v1429_v21, 7  ;;  %v1428_v49 = vmul.f32 %v1427_v47, %v1392_v8 }
0x1138   :  { %v1433_v48 = vsub.f32 %v17_v24, %v1431_v30 }
0x113a   :  { %v1437_v50 = vrot.slane %v1433_v48, %v1751_v31 }
0x113c   :  { %v1438_v5 = vadd.f32 %v1437_v50, %v1428_v49 }
0x113e   :  { %v1521_v29 = vmul.f32 -1.442695, %v1438_v5 }
0x1140   :  { %1639 = vpow2.f32 %v1521_v29 }
0x114d   :  { %v1640_v15 = vpop.eup %1639 }
0x114e   :  { %v1442_v32 = vadd.f32 1.0, %v1640_v15 }
0x1150   :  { %1641 = vrcp.f32 %v1442_v32 }
0x1151   :  { %1656 = shalt.err (!%p1653_p4)
}
0x1152   :  { %1472 = dma.vmem_to_hbm [thread:$0]  %s1470_s19, 16, %s2219_s3, [#allocation5]  }
0x1153   :  { %s1698_s23 = smov [#allocation2]  }
0x1154   :  { %s1459_s24 = sshll.u32 %s1698_s23, 4  ;;  %s1460_s24 = int_to_ptr.vmem [resolvable:$true] %s1459_s24 }
0x1155   :  { %s1665_s25 = scalar_lea.vmem %s1460_s24, 128  ;;  %p1670_p6 = scmp.lt.s32.totalorder %s1460_s24, %s1460_s24 }
0x1156   :  { %p1666_p5 = scmp.ne.s32.totalorder %s1460_s24, %s1665_s25  ;;  %p1671_p7 = scmp.lt.s32.totalorder %s1665_s25, %s1665_s25 }
0x1158   :  { %p1672_p8 = por %p1671_p7, %p1670_p6 }
0x115a   :  { %p1673_p9 = pnand %p1672_p8, %p1666_p5 }
0x115d   :  { %v1642_v26 = vpop.eup %1641 }
0x115e   :  { %1446 = vrot.lane.b32.xlu0 %v1642_v26, %s1692_s17 }
0x11d0   :  { %v1447_v31 = vpop.permute.xlu0 %1446 }
0x11d1   :  { %v1449_v33 = vmul.f32 %v1447_v31, %v1438_v5 }
0x11d3   :  { %v1450_v16 = vadd.f32 %v1449_v33, %v2190_v41 }
0x11d5   :  { %v1451_v62 = vmul.f32 0.70710677, %v1450_v16 }
0x11d7   :  { %1452 = vst.msk [vmem:[#allocation2] sm:$0xff] %vm98_vm2, %v1451_v62 }
0x11d8   :  { %1676 = shalt.err (!%p1673_p9)
}
0x11d9   :  { %1462 = dma.vmem_to_hbm [thread:$0]  %s1460_s24, 128, %s2218_s2, [#allocation3]  }
0x11da   :  { %1685 = dma.done.wait [#allocation3], 128  }
0x11db   :  { %1686 = vsyncadd [#allocation3], 4294967168 }
0x11dc   :  { %1687 = dma.done.wait [#allocation5], 16  }
0x11dd   :  { %1688 = vsyncadd [#allocation5], 4294967280 }
0x11de   :  { %1479 = vsyncpa [#allocation3], 1 }
0x11df   :  { %1480 = vsyncpa [#allocation5], 1 }

</bundles_post_ra>
